<compile_context>
chip_gen: v7x
topology: tpu7x:2x2x1
jax: 0.10.0
libtpu: 0.0.40
codegen_flags: <defaults>
</compile_context>

<pallas_src>
import functools

import numpy as np
import jax
import jax.numpy as jnp
from jax import lax
from jax.experimental import pallas as pl
from jax.experimental.pallas import tpu as pltpu

NEG_SLOPE = 0.01   # PyTorch F.leaky_relu / nn.LeakyReLU default slope
BN_EPS = 1e-5      # PyTorch BatchNorm2d default eps


def _round_up(v, m):
    return (v + m - 1) // m * m


def _leaky(x):
    return jnp.where(x >= 0, x, NEG_SLOPE * x)


# --------------------------- fused Pallas kernel -----------------------------

def _make_fused_kernel(H, W, L, offsets, down_size):
    # static per-tap (dy, dx, lane-roll amount) for a padding=1 3x3 conv on the
    # flattened (C, N*H*W) layout: shifted[p] = x[p + dy*W + dx].  Rolls that
    # cross a sample boundary are exactly the positions the mask zeroes out.
    taps = []
    for dy in (-1, 0, 1):
        for dx in (-1, 0, 1):
            taps.append((dy, dx, (-(dy * W + dx)) % L))

    def kernel(x_ref, prm_ref, msk_ref, *rest):
        if down_size:
            pool_ref, out_ref, down_ref = rest
        else:
            out_ref, down_ref = rest

        def prm(name):
            r0, nr, nc = offsets[name]          # static offsets into the slab
            return prm_ref[r0:r0 + nr, 0:nc]

        def conv3x3(inp, wname, bname):
            # inp: (cin, L) with cin % 8 == 0 -> every tap lands 8-aligned
            cols = []
            for t, (dy, dx, s) in enumerate(taps):
                shifted = inp if s == 0 else pltpu.roll(inp, shift=s, axis=1)
                if not (dy == 0 and dx == 0):
                    shifted = shifted * msk_ref[t:t + 1, :]
                cols.append(shifted)
            slab = jnp.concatenate(cols, axis=0)            # (9*cin, L)
            return jnp.dot(prm(wname), slab,
                           preferred_element_type=jnp.float32) + prm(bname)

        def conv1x1(inp, wname, bname):
            return jnp.dot(prm(wname), inp,
                           preferred_element_type=jnp.float32) + prm(bname)

        x = x_ref[...]                                      # (cin_pad, L)

        # x1 = act(conv1(bn(x)))   (conv applied directly to bn(x), no act)
        xb = x * prm('bn_s') + prm('bn_b')
        x1 = _leaky(conv3x3(xb, 'w1', 'b1'))

        # x22 = act(conv22(conv21(cat[x, x1])))
        x21 = jnp.concatenate([x, x1], axis=0)              # 8-aligned concat
        x22 = _leaky(conv3x3(conv1x1(x21, 'w21', 'b21'), 'w22', 'b22'))

        # o = act(conv32(conv31(cat[x21, x22])))
        x31 = jnp.concatenate([x21, x22], axis=0)           # 8-aligned concat
        o = _leaky(conv3x3(conv1x1(x31, 'w31', 'b31'), 'w32', 'b32'))

        out = jnp.concatenate([o, x], axis=0)               # (out_rows, L)
        out_ref[...] = out

        # Transition_down: act(norm(out)) -> avg_pool -> conv1x1
        # (pool and the 1x1 conv commute; pooling first shrinks the conv)
        td = _leaky(out * prm('td_s') + prm('td_b'))
        if down_size:
            td = jnp.dot(td, pool_ref[...],
                         preferred_element_type=jnp.float32)  # (out_rows, Lo)
        down_ref[...] = (jnp.dot(prm('wtd'), td,
                                 preferred_element_type=jnp.float32)
                         + prm('btd'))

    return kernel


# --------------------------- parameter prep ----------------------------------

def _bn_affine(g, b, m, v, c_pad):
    scale = g / jnp.sqrt(v + BN_EPS)
    shift = b - m * scale
    scale = jnp.pad(scale, (0, c_pad - scale.shape[0]))[:, None]   # (c_pad, 1)
    shift = jnp.pad(shift, (0, c_pad - shift.shape[0]))[:, None]
    return scale, shift


def _w3(w, cin_pad):
    # torch (O, I, 3, 3) -> tap-major (O, 9*cin_pad), padded input channels = 0
    O, I = w.shape[0], w.shape[1]
    wt = jnp.transpose(w, (2, 3, 0, 1))                        # (3, 3, O, I)
    wt = jnp.pad(wt, ((0, 0), (0, 0), (0, 0), (0, cin_pad - I)))
    return jnp.transpose(wt, (2, 0, 1, 3)).reshape(O, 9 * cin_pad)


def _w1_cols(w, col_map, total_cols):
    # torch (O, I, 1, 1) -> (O, total_cols) with columns scattered so that the
    # padded-channel columns are zero.
    out = jnp.zeros((w.shape[0], total_cols), jnp.float32)
    return out.at[:, jnp.asarray(col_map)].set(w[:, :, 0, 0])


def _bv(b):
    return b[:, None]                                          # (O, 1)


def _pack_params(entries):
    # Pack every (rows, cols) block into ONE f32 slab: rows 8-aligned per block,
    # lanes padded to a common multiple of 128.  Returns (slab, offsets).
    lanes = max(_round_up(a.shape[1], 128) for _, a in entries)
    offsets, blocks, r = {}, [], 0
    for name, a in entries:
        nr, nc = a.shape
        nr_pad = _round_up(nr, 8)
        offsets[name] = (r, nr, nc)
        blocks.append(jnp.pad(a.astype(jnp.float32),
                              ((0, nr_pad - nr), (0, lanes - nc))))
        r += nr_pad
    return jnp.concatenate(blocks, axis=0), offsets


def _mask_slab(H, W, N):
    # (16, N*H*W) f32: row t = validity mask of 3x3 tap t (per-sample, repeats
    # every H*W lanes).  Rows 9..15 are padding.
    HW = H * W
    L = N * HW
    p = np.arange(L) % HW
    yy, xx = p // W, p % W
    rows = []
    for dy in (-1, 0, 1):
        for dx in (-1, 0, 1):
            rows.append(((yy + dy >= 0) & (yy + dy < H) &
                         (xx + dx >= 0) & (xx + dx < W)).astype(np.float32))
    m = np.stack(rows, axis=0)
    m = np.concatenate([m, np.zeros((_round_up(9, 8) - 9, L), np.float32)], 0)
    return jnp.asarray(m)


def _pool_matrix(H, W, N, k):
    # Block-diagonal average-pooling matrix over the batch-folded lane axis:
    # (N*H*W, N*Ho*Wo).  TODO(synk): use separable pooling at large H*W.
    HW = H * W
    Ho, Wo = H // k, W // k
    P = np.zeros((N * HW, N * Ho * Wo), np.float32)
    for n in range(N):
        for y in range(H):
            for x in range(W):
                P[n * HW + y * W + x,
                  n * Ho * Wo + (y // k) * Wo + (x // k)] = 1.0 / (k * k)
    return jnp.asarray(P)


# --------------------------- module forward (Pallas) -------------------------

def densenet_down_block(x_nchw, p, *, down_size):
    N, in_c, H, W = x_nchw.shape
    HW = H * W
    L = N * HW
    inter_c = p['conv1_w'].shape[0]          # 8 here (multiple of 8)
    op_c = p['td_conv_w'].shape[0]
    td_c = in_c + inter_c
    cin_pad = _round_up(in_c, 8)
    out_rows = cin_pad + inter_c             # padded channel count of `out`

    # NCHW -> channel-major (cin_pad, N*HW), batch folded into the lane axis.
    x = jnp.transpose(x_nchw, (1, 0, 2, 3)).reshape(in_c, L).astype(jnp.float32)
    x = jnp.pad(x, ((0, cin_pad - in_c), (0, 0)))

    bn_s, bn_b = _bn_affine(p['bn_g'], p['bn_b'], p['bn_m'], p['bn_v'], cin_pad)
    td_s, td_b = _bn_affine(p['td_bn_g'], p['td_bn_b'],
                            p['td_bn_m'], p['td_bn_v'], out_rows)

    # 1x1 weights remapped onto the padded channel layout (padded cols = 0)
    col21 = list(range(in_c)) + list(range(cin_pad, cin_pad + inter_c))
    col31 = list(range(in_c)) + list(range(cin_pad, cin_pad + 2 * inter_c))
    wtd = jnp.pad(p['td_conv_w'][:, :, 0, 0], ((0, 0), (0, out_rows - td_c)))

    entries = [
        ('w1',  _w3(p['conv1_w'], cin_pad)),
        ('w22', _w3(p['conv22_w'], inter_c)),
        ('w32', _w3(p['conv32_w'], inter_c)),
        ('w21', _w1_cols(p['conv21_w'], col21, cin_pad + inter_c)),
        ('w31', _w1_cols(p['conv31_w'], col31, cin_pad + 2 * inter_c)),
        ('wtd', wtd),
        ('bn_s', bn_s), ('bn_b', bn_b),
        ('b1', _bv(p['conv1_b'])), ('b21', _bv(p['conv21_b'])),
        ('b22', _bv(p['conv22_b'])), ('b31', _bv(p['conv31_b'])),
        ('b32', _bv(p['conv32_b'])),
        ('td_s', td_s), ('td_b', td_b),
        ('btd', _bv(p['td_conv_b'])),
    ]
    prm, offsets = _pack_params(entries)
    masks = _mask_slab(H, W, N)

    inputs = [x, prm, masks]
    if down_size:
        Ho, Wo = H // down_size, W // down_size
        Lo = N * Ho * Wo
        inputs.append(_pool_matrix(H, W, N, down_size))
    else:
        Ho, Wo = H, W
        Lo = L

    in_specs = [pl.BlockSpec(a.shape, lambda i: (0, 0)) for a in inputs]
    out_specs = (pl.BlockSpec((out_rows, L), lambda i: (0, 0)),
                 pl.BlockSpec((op_c, Lo), lambda i: (0, 0)))

    kernel = _make_fused_kernel(H, W, L, offsets, down_size)

    # Advisory cost estimate (MXU flops dominate; no transcendentals)
    flops = 2 * L * (inter_c * 9 * cin_pad
                     + inter_c * (cin_pad + inter_c)
                     + inter_c * 9 * inter_c
                     + inter_c * (cin_pad + 2 * inter_c)
                     + inter_c * 9 * inter_c)
    if down_size:
        flops += 2 * out_rows * L * Lo
    flops += 2 * op_c * out_rows * Lo
    bytes_accessed = 4 * (sum(int(a.size) for a in inputs)
                          + out_rows * L + op_c * Lo)
    cost = pl.CostEstimate(flops=int(flops), transcendentals=0,
                           bytes_accessed=int(bytes_accessed))

    out_p, down_p = pl.pallas_call(
        kernel,
        out_shape=(jax.ShapeDtypeStruct((out_rows, L), jnp.float32),
                   jax.ShapeDtypeStruct((op_c, Lo), jnp.float32)),
        grid=(1,),
        in_specs=in_specs,
        out_specs=out_specs,
        compiler_params=pltpu.CompilerParams(
            dimension_semantics=("arbitrary",)),
        cost_estimate=cost,
    )(*inputs)

    out = jnp.transpose(out_p.reshape(out_rows, N, H, W), (1, 0, 2, 3))[:, :td_c]
    down = jnp.transpose(down_p.reshape(op_c, N, Ho, Wo), (1, 0, 2, 3))
    return out, down


# --------------------------- parameter setup ---------------------------------

def init_params(key, in_c, inter_c, op_c):
    td_c = in_c + inter_c
    keys = jax.random.split(key, 32)
    it = iter(range(32))

    def conv(o, i, kh, kw):
        kw_, kb_ = keys[next(it)], keys[next(it)]
        fan_in = i * kh * kw
        w = jax.random.normal(kw_, (o, i, kh, kw), jnp.float32) / np.sqrt(fan_in)
        b = 0.1 * jax.random.normal(kb_, (o,), jnp.float32)
        return w, b

    def bn(c):
        kg, kb, km, kv = (keys[next(it)] for _ in range(4))
        g = 1.0 + 0.1 * jax.random.normal(kg, (c,), jnp.float32)
        b = 0.1 * jax.random.normal(kb, (c,), jnp.float32)
        m = 0.1 * jax.random.normal(km, (c,), jnp.float32)
        v = 0.5 + jnp.abs(jax.random.normal(kv, (c,), jnp.float32)) * 0.5
        return g, b, m, v

    p = {}
    p['conv1_w'], p['conv1_b'] = conv(inter_c, in_c, 3, 3)
    p['conv21_w'], p['conv21_b'] = conv(inter_c, in_c + inter_c, 1, 1)
    p['conv22_w'], p['conv22_b'] = conv(inter_c, inter_c, 3, 3)
    p['conv31_w'], p['conv31_b'] = conv(inter_c, in_c + 2 * inter_c, 1, 1)
    p['conv32_w'], p['conv32_b'] = conv(inter_c, inter_c, 3, 3)
    p['bn_g'], p['bn_b'], p['bn_m'], p['bn_v'] = bn(in_c)
    p['td_bn_g'], p['td_bn_b'], p['td_bn_m'], p['td_bn_v'] = bn(td_c)
    p['td_conv_w'], p['td_conv_b'] = conv(op_c, td_c, 1, 1)
    return p


# --------------------------- pure-JAX reference -------------------------------

def _ref_conv(x, w, b, pad):
    w_hwio = jnp.transpose(w, (2, 3, 1, 0))
    y = lax.conv_general_dilated(x, w_hwio, (1, 1), pad,
                                 dimension_numbers=('NHWC', 'HWIO', 'NHWC'),
                                 precision=lax.Precision.HIGHEST)
    return y + b


def ref_forward(x_nchw, p, down_size):
    x = jnp.transpose(x_nchw, (0, 2, 3, 1)).astype(jnp.float32)

    def bn(x_, g, b, m, v):
        return (x_ - m) / jnp.sqrt(v + BN_EPS) * g + b

    pad3 = ((1, 1), (1, 1))
    pad1 = ((0, 0), (0, 0))

    x1 = _leaky(_ref_conv(bn(x, p['bn_g'], p['bn_b'], p['bn_m'], p['bn_v']),
                          p['conv1_w'], p['conv1_b'], pad3))
    x21 = jnp.concatenate([x, x1], axis=-1)
    x22 = _leaky(_ref_conv(_ref_conv(x21, p['conv21_w'], p['conv21_b'], pad1),
                           p['conv22_w'], p['conv22_b'], pad3))
    x31 = jnp.concatenate([x21, x22], axis=-1)
    o = _leaky(_ref_conv(_ref_conv(x31, p['conv31_w'], p['conv31_b'], pad1),
                         p['conv32_w'], p['conv32_b'], pad3))
    out = jnp.concatenate([o, x], axis=-1)

    td = _leaky(bn(out, p['td_bn_g'], p['td_bn_b'], p['td_bn_m'], p['td_bn_v']))
    td = _ref_conv(td, p['td_conv_w'], p['td_conv_b'], pad1)
    if down_size:
        Nn, Hh, Ww, Cc = td.shape
        k = down_size
        td = td.reshape(Nn, Hh // k, k, Ww // k, k, Cc).mean(axis=(2, 4))

    return (jnp.transpose(out, (0, 3, 1, 2)),
            jnp.transpose(td, (0, 3, 1, 2)))


# --------------------------- main --------------------------------------------

if __name__ == "__main__":
    N, in_c, H, W = 2, 4, 16, 16
    inter_c, op_c, down_size = 8, 8, 2

    key = jax.random.PRNGKey(0)
    kx, kp = jax.random.split(key)
    x_nchw = jax.random.normal(kx, (N, in_c, H, W), jnp.float32)
    params = init_params(kp, in_c, inter_c, op_c)

    fwd = jax.jit(functools.partial(densenet_down_block, down_size=down_size))
    out, down = fwd(x_nchw, params)
    jax.block_until_ready((out, down))

    ref_out, ref_down = ref_forward(x_nchw, params, down_size)
    np.testing.assert_allclose(np.asarray(out), np.asarray(ref_out),
                               rtol=1e-3, atol=1e-3)
    np.testing.assert_allclose(np.asarray(down), np.asarray(ref_down),
                               rtol=1e-3, atol=1e-3)

    print("KERNEL_OK")
</pallas_src>

<mosaic_0001>
module attributes {stable_mosaic.version = 11 : i64} {
  func.func @kernel(%arg0: i32, %arg1: memref<8x512xf32, #tpu.memory_space<vmem>>, %arg2: memref<144x128xf32, #tpu.memory_space<vmem>>, %arg3: memref<16x512xf32, #tpu.memory_space<vmem>>, %arg4: memref<512x128xf32, #tpu.memory_space<vmem>>, %arg5: memref<16x512xf32, #tpu.memory_space<vmem>>, %arg6: memref<8x128xf32, #tpu.memory_space<vmem>>) attributes {dimension_semantics = [#tpu.dimension_semantics<arbitrary>], iteration_bounds = array<i64: 1>, scalar_prefetch = 0 : i64, scratch_operands = 0 : i64, tpu.core_type = #tpu.core_type<tc>, window_params = [{pipeline_mode = #tpu.pipeline_mode<synchronous>, transform_indices = @transform_0, window_bounds = array<i64: 8, 512>}, {pipeline_mode = #tpu.pipeline_mode<synchronous>, transform_indices = @transform_1, window_bounds = array<i64: 144, 128>}, {pipeline_mode = #tpu.pipeline_mode<synchronous>, transform_indices = @transform_2, window_bounds = array<i64: 16, 512>}, {pipeline_mode = #tpu.pipeline_mode<synchronous>, transform_indices = @transform_3, window_bounds = array<i64: 512, 128>}, {pipeline_mode = #tpu.pipeline_mode<synchronous>, transform_indices = @transform_4, window_bounds = array<i64: 16, 512>}, {pipeline_mode = #tpu.pipeline_mode<synchronous>, transform_indices = @transform_5, window_bounds = array<i64: 8, 128>}]} {
    %c0 = arith.constant 0 : index
    %c0_0 = arith.constant 0 : index
    %0 = vector.load %arg1[%c0, %c0_0] : memref<8x512xf32, #tpu.memory_space<vmem>>, vector<8x512xf32>
    %c48 = arith.constant 48 : index
    %c0_1 = arith.constant 0 : index
    %1 = vector.load %arg2[%c48, %c0_1] : memref<144x128xf32, #tpu.memory_space<vmem>>, vector<8x1xf32>
    %2 = vector.broadcast %1 : vector<8x1xf32> to vector<8x512xf32>
    %3 = arith.mulf %0, %2 : vector<8x512xf32>
    %c56 = arith.constant 56 : index
    %c0_2 = arith.constant 0 : index
    %4 = vector.load %arg2[%c56, %c0_2] : memref<144x128xf32, #tpu.memory_space<vmem>>, vector<8x1xf32>
    %5 = vector.broadcast %4 : vector<8x1xf32> to vector<8x512xf32>
    %6 = arith.addf %3, %5 : vector<8x512xf32>
    %c17_i32 = arith.constant 17 : i32
    %7 = tpu.dynamic_rotate %6 by %c17_i32 dim 1 : vector<8x512xf32>, i32 -> vector<8x512xf32>
    %c0_3 = arith.constant 0 : index
    %c0_4 = arith.constant 0 : index
    %8 = vector.load %arg3[%c0_3, %c0_4] : memref<16x512xf32, #tpu.memory_space<vmem>>, vector<1x512xf32>
    %9 = vector.broadcast %8 : vector<1x512xf32> to vector<8x512xf32>
    %10 = arith.mulf %7, %9 : vector<8x512xf32>
    %c16_i32 = arith.constant 16 : i32
    %11 = tpu.dynamic_rotate %6 by %c16_i32 dim 1 : vector<8x512xf32>, i32 -> vector<8x512xf32>
    %c1 = arith.constant 1 : index
    %c0_5 = arith.constant 0 : index
    %12 = vector.load %arg3[%c1, %c0_5] : memref<16x512xf32, #tpu.memory_space<vmem>>, vector<1x512xf32>
    %13 = vector.broadcast %12 : vector<1x512xf32> to vector<8x512xf32>
    %14 = arith.mulf %11, %13 : vector<8x512xf32>
    %c15_i32 = arith.constant 15 : i32
    %15 = tpu.dynamic_rotate %6 by %c15_i32 dim 1 : vector<8x512xf32>, i32 -> vector<8x512xf32>
    %c2 = arith.constant 2 : index
    %c0_6 = arith.constant 0 : index
    %16 = vector.load %arg3[%c2, %c0_6] : memref<16x512xf32, #tpu.memory_space<vmem>>, vector<1x512xf32>
    %17 = vector.broadcast %16 : vector<1x512xf32> to vector<8x512xf32>
    %18 = arith.mulf %15, %17 : vector<8x512xf32>
    %c1_i32 = arith.constant 1 : i32
    %19 = tpu.dynamic_rotate %6 by %c1_i32 dim 1 : vector<8x512xf32>, i32 -> vector<8x512xf32>
    %c3 = arith.constant 3 : index
    %c0_7 = arith.constant 0 : index
    %20 = vector.load %arg3[%c3, %c0_7] : memref<16x512xf32, #tpu.memory_space<vmem>>, vector<1x512xf32>
    %21 = vector.broadcast %20 : vector<1x512xf32> to vector<8x512xf32>
    %22 = arith.mulf %19, %21 : vector<8x512xf32>
    %c511_i32 = arith.constant 511 : i32
    %23 = tpu.dynamic_rotate %6 by %c511_i32 dim 1 : vector<8x512xf32>, i32 -> vector<8x512xf32>
    %c5 = arith.constant 5 : index
    %c0_8 = arith.constant 0 : index
    %24 = vector.load %arg3[%c5, %c0_8] : memref<16x512xf32, #tpu.memory_space<vmem>>, vector<1x512xf32>
    %25 = vector.broadcast %24 : vector<1x512xf32> to vector<8x512xf32>
    %26 = arith.mulf %23, %25 : vector<8x512xf32>
    %c497_i32 = arith.constant 497 : i32
    %27 = tpu.dynamic_rotate %6 by %c497_i32 dim 1 : vector<8x512xf32>, i32 -> vector<8x512xf32>
    %c6 = arith.constant 6 : index
    %c0_9 = arith.constant 0 : index
    %28 = vector.load %arg3[%c6, %c0_9] : memref<16x512xf32, #tpu.memory_space<vmem>>, vector<1x512xf32>
    %29 = vector.broadcast %28 : vector<1x512xf32> to vector<8x512xf32>
    %30 = arith.mulf %27, %29 : vector<8x512xf32>
    %c496_i32 = arith.constant 496 : i32
    %31 = tpu.dynamic_rotate %6 by %c496_i32 dim 1 : vector<8x512xf32>, i32 -> vector<8x512xf32>
    %c7 = arith.constant 7 : index
    %c0_10 = arith.constant 0 : index
    %32 = vector.load %arg3[%c7, %c0_10] : memref<16x512xf32, #tpu.memory_space<vmem>>, vector<1x512xf32>
    %33 = vector.broadcast %32 : vector<1x512xf32> to vector<8x512xf32>
    %34 = arith.mulf %31, %33 : vector<8x512xf32>
    %c495_i32 = arith.constant 495 : i32
    %35 = tpu.dynamic_rotate %6 by %c495_i32 dim 1 : vector<8x512xf32>, i32 -> vector<8x512xf32>
    %c8 = arith.constant 8 : index
    %c0_11 = arith.constant 0 : index
    %36 = vector.load %arg3[%c8, %c0_11] : memref<16x512xf32, #tpu.memory_space<vmem>>, vector<1x512xf32>
    %37 = vector.broadcast %36 : vector<1x512xf32> to vector<8x512xf32>
    %38 = arith.mulf %35, %37 : vector<8x512xf32>
    %39 = tpu.concatenate %10, %14, %18, %22, %6, %26, %30, %34, %38 in 0 : vector<8x512xf32>, vector<8x512xf32>, vector<8x512xf32>, vector<8x512xf32>, vector<8x512xf32>, vector<8x512xf32>, vector<8x512xf32>, vector<8x512xf32>, vector<8x512xf32> -> vector<72x512xf32>
    %c0_12 = arith.constant 0 : index
    %c0_13 = arith.constant 0 : index
    %40 = vector.load %arg2[%c0_12, %c0_13] : memref<144x128xf32, #tpu.memory_space<vmem>>, vector<8x72xf32>
    %cst = arith.constant dense<0.000000e+00> : vector<8x512xf32>
    %41 = tpu.matmul %40, %39, %cst {dimension_numbers = #tpu.dot_dimension_numbers<[1], [0], [0], [1], [0, 0, 1, 1], [], []>} : vector<8x72xf32>, vector<72x512xf32>, vector<8x512xf32> -> vector<8x512xf32>
    %c64 = arith.constant 64 : index
    %c0_14 = arith.constant 0 : index
    %42 = vector.load %arg2[%c64, %c0_14] : memref<144x128xf32, #tpu.memory_space<vmem>>, vector<8x1xf32>
    %43 = vector.broadcast %42 : vector<8x1xf32> to vector<8x512xf32>
    %44 = arith.addf %41, %43 : vector<8x512xf32>
    %cst_15 = arith.constant 0.000000e+00 : f32
    %45 = vector.broadcast %cst_15 : f32 to vector<8x512xf32>
    %46 = arith.cmpf oge, %44, %45 : vector<8x512xf32>
    %cst_16 = arith.constant 0.00999999977 : f32
    %47 = vector.broadcast %cst_16 : f32 to vector<8x512xf32>
    %48 = arith.mulf %47, %44 : vector<8x512xf32>
    %49 = arith.select %46, %44, %48 : vector<8x512xi1>, vector<8x512xf32>
    %50 = tpu.concatenate %0, %49 in 0 : vector<8x512xf32>, vector<8x512xf32> -> vector<16x512xf32>
    %c24 = arith.constant 24 : index
    %c0_17 = arith.constant 0 : index
    %51 = vector.load %arg2[%c24, %c0_17] : memref<144x128xf32, #tpu.memory_space<vmem>>, vector<8x16xf32>
    %cst_18 = arith.constant dense<0.000000e+00> : vector<8x512xf32>
    %52 = tpu.matmul %51, %50, %cst_18 {dimension_numbers = #tpu.dot_dimension_numbers<[1], [0], [0], [1], [0, 0, 1, 1], [], []>} : vector<8x16xf32>, vector<16x512xf32>, vector<8x512xf32> -> vector<8x512xf32>
    %c72 = arith.constant 72 : index
    %c0_19 = arith.constant 0 : index
    %53 = vector.load %arg2[%c72, %c0_19] : memref<144x128xf32, #tpu.memory_space<vmem>>, vector<8x1xf32>
    %54 = vector.broadcast %53 : vector<8x1xf32> to vector<8x512xf32>
    %55 = arith.addf %52, %54 : vector<8x512xf32>
    %c17_i32_20 = arith.constant 17 : i32
    %56 = tpu.dynamic_rotate %55 by %c17_i32_20 dim 1 : vector<8x512xf32>, i32 -> vector<8x512xf32>
    %c0_21 = arith.constant 0 : index
    %c0_22 = arith.constant 0 : index
    %57 = vector.load %arg3[%c0_21, %c0_22] : memref<16x512xf32, #tpu.memory_space<vmem>>, vector<1x512xf32>
    %58 = vector.broadcast %57 : vector<1x512xf32> to vector<8x512xf32>
    %59 = arith.mulf %56, %58 : vector<8x512xf32>
    %c16_i32_23 = arith.constant 16 : i32
    %60 = tpu.dynamic_rotate %55 by %c16_i32_23 dim 1 : vector<8x512xf32>, i32 -> vector<8x512xf32>
    %c1_24 = arith.constant 1 : index
    %c0_25 = arith.constant 0 : index
    %61 = vector.load %arg3[%c1_24, %c0_25] : memref<16x512xf32, #tpu.memory_space<vmem>>, vector<1x512xf32>
    %62 = vector.broadcast %61 : vector<1x512xf32> to vector<8x512xf32>
    %63 = arith.mulf %60, %62 : vector<8x512xf32>
    %c15_i32_26 = arith.constant 15 : i32
    %64 = tpu.dynamic_rotate %55 by %c15_i32_26 dim 1 : vector<8x512xf32>, i32 -> vector<8x512xf32>
    %c2_27 = arith.constant 2 : index
    %c0_28 = arith.constant 0 : index
    %65 = vector.load %arg3[%c2_27, %c0_28] : memref<16x512xf32, #tpu.memory_space<vmem>>, vector<1x512xf32>
    %66 = vector.broadcast %65 : vector<1x512xf32> to vector<8x512xf32>
    %67 = arith.mulf %64, %66 : vector<8x512xf32>
    %c1_i32_29 = arith.constant 1 : i32
    %68 = tpu.dynamic_rotate %55 by %c1_i32_29 dim 1 : vector<8x512xf32>, i32 -> vector<8x512xf32>
    %c3_30 = arith.constant 3 : index
    %c0_31 = arith.constant 0 : index
    %69 = vector.load %arg3[%c3_30, %c0_31] : memref<16x512xf32, #tpu.memory_space<vmem>>, vector<1x512xf32>
    %70 = vector.broadcast %69 : vector<1x512xf32> to vector<8x512xf32>
    %71 = arith.mulf %68, %70 : vector<8x512xf32>
    %c511_i32_32 = arith.constant 511 : i32
    %72 = tpu.dynamic_rotate %55 by %c511_i32_32 dim 1 : vector<8x512xf32>, i32 -> vector<8x512xf32>
    %c5_33 = arith.constant 5 : index
    %c0_34 = arith.constant 0 : index
    %73 = vector.load %arg3[%c5_33, %c0_34] : memref<16x512xf32, #tpu.memory_space<vmem>>, vector<1x512xf32>
    %74 = vector.broadcast %73 : vector<1x512xf32> to vector<8x512xf32>
    %75 = arith.mulf %72, %74 : vector<8x512xf32>
    %c497_i32_35 = arith.constant 497 : i32
    %76 = tpu.dynamic_rotate %55 by %c497_i32_35 dim 1 : vector<8x512xf32>, i32 -> vector<8x512xf32>
    %c6_36 = arith.constant 6 : index
    %c0_37 = arith.constant 0 : index
    %77 = vector.load %arg3[%c6_36, %c0_37] : memref<16x512xf32, #tpu.memory_space<vmem>>, vector<1x512xf32>
    %78 = vector.broadcast %77 : vector<1x512xf32> to vector<8x512xf32>
    %79 = arith.mulf %76, %78 : vector<8x512xf32>
    %c496_i32_38 = arith.constant 496 : i32
    %80 = tpu.dynamic_rotate %55 by %c496_i32_38 dim 1 : vector<8x512xf32>, i32 -> vector<8x512xf32>
    %c7_39 = arith.constant 7 : index
    %c0_40 = arith.constant 0 : index
    %81 = vector.load %arg3[%c7_39, %c0_40] : memref<16x512xf32, #tpu.memory_space<vmem>>, vector<1x512xf32>
    %82 = vector.broadcast %81 : vector<1x512xf32> to vector<8x512xf32>
    %83 = arith.mulf %80, %82 : vector<8x512xf32>
    %c495_i32_41 = arith.constant 495 : i32
    %84 = tpu.dynamic_rotate %55 by %c495_i32_41 dim 1 : vector<8x512xf32>, i32 -> vector<8x512xf32>
    %c8_42 = arith.constant 8 : index
    %c0_43 = arith.constant 0 : index
    %85 = vector.load %arg3[%c8_42, %c0_43] : memref<16x512xf32, #tpu.memory_space<vmem>>, vector<1x512xf32>
    %86 = vector.broadcast %85 : vector<1x512xf32> to vector<8x512xf32>
    %87 = arith.mulf %84, %86 : vector<8x512xf32>
    %88 = tpu.concatenate %59, %63, %67, %71, %55, %75, %79, %83, %87 in 0 : vector<8x512xf32>, vector<8x512xf32>, vector<8x512xf32>, vector<8x512xf32>, vector<8x512xf32>, vector<8x512xf32>, vector<8x512xf32>, vector<8x512xf32>, vector<8x512xf32> -> vector<72x512xf32>
    %c8_44 = arith.constant 8 : index
    %c0_45 = arith.constant 0 : index
    %89 = vector.load %arg2[%c8_44, %c0_45] : memref<144x128xf32, #tpu.memory_space<vmem>>, vector<8x72xf32>
    %cst_46 = arith.constant dense<0.000000e+00> : vector<8x512xf32>
    %90 = tpu.matmul %89, %88, %cst_46 {dimension_numbers = #tpu.dot_dimension_numbers<[1], [0], [0], [1], [0, 0, 1, 1], [], []>} : vector<8x72xf32>, vector<72x512xf32>, vector<8x512xf32> -> vector<8x512xf32>
    %c80 = arith.constant 80 : index
    %c0_47 = arith.constant 0 : index
    %91 = vector.load %arg2[%c80, %c0_47] : memref<144x128xf32, #tpu.memory_space<vmem>>, vector<8x1xf32>
    %92 = vector.broadcast %91 : vector<8x1xf32> to vector<8x512xf32>
    %93 = arith.addf %90, %92 : vector<8x512xf32>
    %cst_48 = arith.constant 0.000000e+00 : f32
    %94 = vector.broadcast %cst_48 : f32 to vector<8x512xf32>
    %95 = arith.cmpf oge, %93, %94 : vector<8x512xf32>
    %cst_49 = arith.constant 0.00999999977 : f32
    %96 = vector.broadcast %cst_49 : f32 to vector<8x512xf32>
    %97 = arith.mulf %96, %93 : vector<8x512xf32>
    %98 = arith.select %95, %93, %97 : vector<8x512xi1>, vector<8x512xf32>
    %99 = tpu.concatenate %50, %98 in 0 : vector<16x512xf32>, vector<8x512xf32> -> vector<24x512xf32>
    %c32 = arith.constant 32 : index
    %c0_50 = arith.constant 0 : index
    %100 = vector.load %arg2[%c32, %c0_50] : memref<144x128xf32, #tpu.memory_space<vmem>>, vector<8x24xf32>
    %cst_51 = arith.constant dense<0.000000e+00> : vector<8x512xf32>
    %101 = tpu.matmul %100, %99, %cst_51 {dimension_numbers = #tpu.dot_dimension_numbers<[1], [0], [0], [1], [0, 0, 1, 1], [], []>} : vector<8x24xf32>, vector<24x512xf32>, vector<8x512xf32> -> vector<8x512xf32>
    %c88 = arith.constant 88 : index
    %c0_52 = arith.constant 0 : index
    %102 = vector.load %arg2[%c88, %c0_52] : memref<144x128xf32, #tpu.memory_space<vmem>>, vector<8x1xf32>
    %103 = vector.broadcast %102 : vector<8x1xf32> to vector<8x512xf32>
    %104 = arith.addf %101, %103 : vector<8x512xf32>
    %c17_i32_53 = arith.constant 17 : i32
    %105 = tpu.dynamic_rotate %104 by %c17_i32_53 dim 1 : vector<8x512xf32>, i32 -> vector<8x512xf32>
    %c0_54 = arith.constant 0 : index
    %c0_55 = arith.constant 0 : index
    %106 = vector.load %arg3[%c0_54, %c0_55] : memref<16x512xf32, #tpu.memory_space<vmem>>, vector<1x512xf32>
    %107 = vector.broadcast %106 : vector<1x512xf32> to vector<8x512xf32>
    %108 = arith.mulf %105, %107 : vector<8x512xf32>
    %c16_i32_56 = arith.constant 16 : i32
    %109 = tpu.dynamic_rotate %104 by %c16_i32_56 dim 1 : vector<8x512xf32>, i32 -> vector<8x512xf32>
    %c1_57 = arith.constant 1 : index
    %c0_58 = arith.constant 0 : index
    %110 = vector.load %arg3[%c1_57, %c0_58] : memref<16x512xf32, #tpu.memory_space<vmem>>, vector<1x512xf32>
    %111 = vector.broadcast %110 : vector<1x512xf32> to vector<8x512xf32>
    %112 = arith.mulf %109, %111 : vector<8x512xf32>
    %c15_i32_59 = arith.constant 15 : i32
    %113 = tpu.dynamic_rotate %104 by %c15_i32_59 dim 1 : vector<8x512xf32>, i32 -> vector<8x512xf32>
    %c2_60 = arith.constant 2 : index
    %c0_61 = arith.constant 0 : index
    %114 = vector.load %arg3[%c2_60, %c0_61] : memref<16x512xf32, #tpu.memory_space<vmem>>, vector<1x512xf32>
    %115 = vector.broadcast %114 : vector<1x512xf32> to vector<8x512xf32>
    %116 = arith.mulf %113, %115 : vector<8x512xf32>
    %c1_i32_62 = arith.constant 1 : i32
    %117 = tpu.dynamic_rotate %104 by %c1_i32_62 dim 1 : vector<8x512xf32>, i32 -> vector<8x512xf32>
    %c3_63 = arith.constant 3 : index
    %c0_64 = arith.constant 0 : index
    %118 = vector.load %arg3[%c3_63, %c0_64] : memref<16x512xf32, #tpu.memory_space<vmem>>, vector<1x512xf32>
    %119 = vector.broadcast %118 : vector<1x512xf32> to vector<8x512xf32>
    %120 = arith.mulf %117, %119 : vector<8x512xf32>
    %c511_i32_65 = arith.constant 511 : i32
    %121 = tpu.dynamic_rotate %104 by %c511_i32_65 dim 1 : vector<8x512xf32>, i32 -> vector<8x512xf32>
    %c5_66 = arith.constant 5 : index
    %c0_67 = arith.constant 0 : index
    %122 = vector.load %arg3[%c5_66, %c0_67] : memref<16x512xf32, #tpu.memory_space<vmem>>, vector<1x512xf32>
    %123 = vector.broadcast %122 : vector<1x512xf32> to vector<8x512xf32>
    %124 = arith.mulf %121, %123 : vector<8x512xf32>
    %c497_i32_68 = arith.constant 497 : i32
    %125 = tpu.dynamic_rotate %104 by %c497_i32_68 dim 1 : vector<8x512xf32>, i32 -> vector<8x512xf32>
    %c6_69 = arith.constant 6 : index
    %c0_70 = arith.constant 0 : index
    %126 = vector.load %arg3[%c6_69, %c0_70] : memref<16x512xf32, #tpu.memory_space<vmem>>, vector<1x512xf32>
    %127 = vector.broadcast %126 : vector<1x512xf32> to vector<8x512xf32>
    %128 = arith.mulf %125, %127 : vector<8x512xf32>
    %c496_i32_71 = arith.constant 496 : i32
    %129 = tpu.dynamic_rotate %104 by %c496_i32_71 dim 1 : vector<8x512xf32>, i32 -> vector<8x512xf32>
    %c7_72 = arith.constant 7 : index
    %c0_73 = arith.constant 0 : index
    %130 = vector.load %arg3[%c7_72, %c0_73] : memref<16x512xf32, #tpu.memory_space<vmem>>, vector<1x512xf32>
    %131 = vector.broadcast %130 : vector<1x512xf32> to vector<8x512xf32>
    %132 = arith.mulf %129, %131 : vector<8x512xf32>
    %c495_i32_74 = arith.constant 495 : i32
    %133 = tpu.dynamic_rotate %104 by %c495_i32_74 dim 1 : vector<8x512xf32>, i32 -> vector<8x512xf32>
    %c8_75 = arith.constant 8 : index
    %c0_76 = arith.constant 0 : index
    %134 = vector.load %arg3[%c8_75, %c0_76] : memref<16x512xf32, #tpu.memory_space<vmem>>, vector<1x512xf32>
    %135 = vector.broadcast %134 : vector<1x512xf32> to vector<8x512xf32>
    %136 = arith.mulf %133, %135 : vector<8x512xf32>
    %137 = tpu.concatenate %108, %112, %116, %120, %104, %124, %128, %132, %136 in 0 : vector<8x512xf32>, vector<8x512xf32>, vector<8x512xf32>, vector<8x512xf32>, vector<8x512xf32>, vector<8x512xf32>, vector<8x512xf32>, vector<8x512xf32>, vector<8x512xf32> -> vector<72x512xf32>
    %c16 = arith.constant 16 : index
    %c0_77 = arith.constant 0 : index
    %138 = vector.load %arg2[%c16, %c0_77] : memref<144x128xf32, #tpu.memory_space<vmem>>, vector<8x72xf32>
    %cst_78 = arith.constant dense<0.000000e+00> : vector<8x512xf32>
    %139 = tpu.matmul %138, %137, %cst_78 {dimension_numbers = #tpu.dot_dimension_numbers<[1], [0], [0], [1], [0, 0, 1, 1], [], []>} : vector<8x72xf32>, vector<72x512xf32>, vector<8x512xf32> -> vector<8x512xf32>
    %c96 = arith.constant 96 : index
    %c0_79 = arith.constant 0 : index
    %140 = vector.load %arg2[%c96, %c0_79] : memref<144x128xf32, #tpu.memory_space<vmem>>, vector<8x1xf32>
    %141 = vector.broadcast %140 : vector<8x1xf32> to vector<8x512xf32>
    %142 = arith.addf %139, %141 : vector<8x512xf32>
    %cst_80 = arith.constant 0.000000e+00 : f32
    %143 = vector.broadcast %cst_80 : f32 to vector<8x512xf32>
    %144 = arith.cmpf oge, %142, %143 : vector<8x512xf32>
    %cst_81 = arith.constant 0.00999999977 : f32
    %145 = vector.broadcast %cst_81 : f32 to vector<8x512xf32>
    %146 = arith.mulf %145, %142 : vector<8x512xf32>
    %147 = arith.select %144, %142, %146 : vector<8x512xi1>, vector<8x512xf32>
    %148 = tpu.concatenate %147, %0 in 0 : vector<8x512xf32>, vector<8x512xf32> -> vector<16x512xf32>
    %c0_82 = arith.constant 0 : index
    %c0_83 = arith.constant 0 : index
    %149 = vector.load %arg5[%c0_82, %c0_83] : memref<16x512xf32, #tpu.memory_space<vmem>>, vector<16x512xf32>
    tpu.vector_store %arg5[%c0_82, %c0_83], %148 {strides = array<i32>} : memref<16x512xf32, #tpu.memory_space<vmem>>, vector<16x512xf32>,
    %c104 = arith.constant 104 : index
    %c0_84 = arith.constant 0 : index
    %150 = vector.load %arg2[%c104, %c0_84] : memref<144x128xf32, #tpu.memory_space<vmem>>, vector<16x1xf32>
    %151 = vector.broadcast %150 : vector<16x1xf32> to vector<16x512xf32>
    %152 = arith.mulf %148, %151 : vector<16x512xf32>
    %c120 = arith.constant 120 : index
    %c0_85 = arith.constant 0 : index
    %153 = vector.load %arg2[%c120, %c0_85] : memref<144x128xf32, #tpu.memory_space<vmem>>, vector<16x1xf32>
    %154 = vector.broadcast %153 : vector<16x1xf32> to vector<16x512xf32>
    %155 = arith.addf %152, %154 : vector<16x512xf32>
    %cst_86 = arith.constant 0.000000e+00 : f32
    %156 = vector.broadcast %cst_86 : f32 to vector<16x512xf32>
    %157 = arith.cmpf oge, %155, %156 : vector<16x512xf32>
    %cst_87 = arith.constant 0.00999999977 : f32
    %158 = vector.broadcast %cst_87 : f32 to vector<16x512xf32>
    %159 = arith.mulf %158, %155 : vector<16x512xf32>
    %160 = arith.select %157, %155, %159 : vector<16x512xi1>, vector<16x512xf32>
    %c0_88 = arith.constant 0 : index
    %c0_89 = arith.constant 0 : index
    %161 = vector.load %arg4[%c0_88, %c0_89] : memref<512x128xf32, #tpu.memory_space<vmem>>, vector<512x128xf32>
    %cst_90 = arith.constant dense<0.000000e+00> : vector<16x128xf32>
    %162 = tpu.matmul %160, %161, %cst_90 {dimension_numbers = #tpu.dot_dimension_numbers<[1], [0], [0], [1], [0, 0, 1, 1], [], []>} : vector<16x512xf32>, vector<512x128xf32>, vector<16x128xf32> -> vector<16x128xf32>
    %c40 = arith.constant 40 : index
    %c0_91 = arith.constant 0 : index
    %163 = vector.load %arg2[%c40, %c0_91] : memref<144x128xf32, #tpu.memory_space<vmem>>, vector<8x16xf32>
    %cst_92 = arith.constant dense<0.000000e+00> : vector<8x128xf32>
    %164 = tpu.matmul %163, %162, %cst_92 {dimension_numbers = #tpu.dot_dimension_numbers<[1], [0], [0], [1], [0, 0, 1, 1], [], []>} : vector<8x16xf32>, vector<16x128xf32>, vector<8x128xf32> -> vector<8x128xf32>
    %c136 = arith.constant 136 : index
    %c0_93 = arith.constant 0 : index
    %165 = vector.load %arg2[%c136, %c0_93] : memref<144x128xf32, #tpu.memory_space<vmem>>, vector<8x1xf32>
    %166 = vector.broadcast %165 : vector<8x1xf32> to vector<8x128xf32>
    %167 = arith.addf %164, %166 : vector<8x128xf32>
    %c0_94 = arith.constant 0 : index
    %c0_95 = arith.constant 0 : index
    %168 = vector.load %arg6[%c0_94, %c0_95] : memref<8x128xf32, #tpu.memory_space<vmem>>, vector<8x128xf32>
    tpu.vector_store %arg6[%c0_94, %c0_95], %167 {strides = array<i32>} : memref<8x128xf32, #tpu.memory_space<vmem>>, vector<8x128xf32>,
    return
  }
  func.func @transform_0(%arg0: i32) -> (i32, i32) {
    %c0_i32 = arith.constant 0 : i32
    %c0_i32_0 = arith.constant 0 : i32
    %c0_i32_1 = arith.constant 0 : i32
    return %c0_i32, %c0_i32_0 : i32, i32
  }
  func.func @transform_1(%arg0: i32) -> (i32, i32) {
    %c0_i32 = arith.constant 0 : i32
    %c0_i32_0 = arith.constant 0 : i32
    %c0_i32_1 = arith.constant 0 : i32
    return %c0_i32, %c0_i32_0 : i32, i32
  }
  func.func @transform_2(%arg0: i32) -> (i32, i32) {
    %c0_i32 = arith.constant 0 : i32
    %c0_i32_0 = arith.constant 0 : i32
    %c0_i32_1 = arith.constant 0 : i32
    return %c0_i32, %c0_i32_0 : i32, i32
  }
  func.func @transform_3(%arg0: i32) -> (i32, i32) {
    %c0_i32 = arith.constant 0 : i32
    %c0_i32_0 = arith.constant 0 : i32
    %c0_i32_1 = arith.constant 0 : i32
    return %c0_i32, %c0_i32_0 : i32, i32
  }
  func.func @transform_4(%arg0: i32) -> (i32, i32) {
    %c0_i32 = arith.constant 0 : i32
    %c0_i32_0 = arith.constant 0 : i32
    %c0_i32_1 = arith.constant 0 : i32
    return %c0_i32, %c0_i32_0 : i32, i32
  }
  func.func @transform_5(%arg0: i32) -> (i32, i32) {
    %c0_i32 = arith.constant 0 : i32
    %c0_i32_0 = arith.constant 0 : i32
    %c0_i32_1 = arith.constant 0 : i32
    return %c0_i32, %c0_i32_0 : i32, i32
  }
}

</mosaic_0001>

<bundles_post_ra>
// kernel: densenet_down_block.1
= control target key start
LH: loop header
LB: loop body
LE: loop exit
PB: predicated region body
PF: predicated region fallthrough
CT: control target
= control target key end

     0   :  { %v2095_v0 = vmov 0   ;;  %s2096_s12 = smov 17   ;;  %s2097_s13 = smov 16   ;;  %v2103_v17 = vmov 0.0   ;;  %v51_v19 = vlaneseq  ;;  %vm371_vm8 = vcmask 588800   ;;  %s3145_s1 = inlined_call_operand.vmem [shape: f32[144,128], index: 1, kind: input, shape index: {}]   ;;  %s3146_s0 = inlined_call_operand.vmem [shape: f32[8,512], index: 0, kind: input, shape index: {}]   ;;  %s3147_s4 = inlined_call_operand.vmem [shape: f32[16,512], index: 4, kind: output, shape index: {0}]   ;;  %s3148_s2 = inlined_call_operand.vmem [shape: f32[16,512], index: 2, kind: input, shape index: {}]   ;;  %s3149_s3 = inlined_call_operand.vmem [shape: f32[512,128], index: 3, kind: input, shape index: {}]   ;;  %s3150_s5 = inlined_call_operand.vmem [shape: f32[8,128], index: 5, kind: output, shape index: {1}]  }
   0x1   :  { %2089 = vset.pattern.permute.xlu0 %v2095_v0  ;;  %v23_v1 = vld [vmem:[%s3145_s1 + $0x30] sm:$0xff]  ;;  %v2143_v2 = vld [vmem:[%s3146_s0] sm:$0xff]  ;;  %2090 = vset.pattern.permute.xlu1 %v2095_v0  ;;  %v2148_v3 = vld [vmem:[%s3146_s0 + $0x8] sm:$0xff]  ;;  %s2098_s14 = smov 15   ;;  %s2099_s15 = smov 1   ;;  %vm536_vm13 = vcmask 130048  }
   0x2   :  { %26 = vperm.xlu0 %2089, %v23_v1   ;;  %v2153_v4 = vld [vmem:[%s3146_s0 + $0x10] sm:$0xff]  ;;  %v2158_v5 = vld [vmem:[%s3146_s0 + $0x18] sm:$0xff]  ;;  %1423 = vst [vmem:[%s3147_s4 + $0x20] sm:$0xff] %v2143_v2  ;;  %1424 = vst [vmem:[%s3147_s4 + $0x28] sm:$0xff] %v2148_v3  ;;  %s2100_s16 = smov 127   ;;  %s2101_s17 = smov 113   ;;  %439 = vmatprep.mubr.f32.mxu0 %v2103_v17 }
   0x3   :  { %v33_v6 = vld [vmem:[%s3145_s1 + $0x38] sm:$0xff]  ;;  %1425 = vst [vmem:[%s3147_s4 + $0x30] sm:$0xff] %v2153_v4  ;;  %1426 = vst [vmem:[%s3147_s4 + $0x38] sm:$0xff] %v2158_v5  ;;  %s2102_s18 = smov 112   ;;  %510 = vmatprep.mubr.f32.mxu1 %v2103_v17  ;;  %s2104_s19 = smov 111   ;;  %v365_v18 = vld [vmem:[%s3145_s1 + $0x40] sm:$0xff] }
   0x4   :  { %v61_v22 = vshrl.u32 %v51_v19, 7  ;;  %v2260_v24 = vand.u32 127, %v51_v19  ;;  %v58_v27 = vld [vmem:[%s3148_s2] ss:$8 sm:$0xf] }
   0x5   :  { %v1794_v28 = vld [vmem:[%s3148_s2 + $0x1] ss:$8 sm:$0xf] }
   0x6   :  { %36 = vperm.xlu0 %2089, %v33_v6   ;;  %v2262_v26 = vsub.s32 1, %v61_v22  ;;  %vm53_vm0 = vcmp.lt.s32.totalorder %v2260_v24, 17  ;;  %v2271_v31 = vsub.s32 0, %v61_v22  ;;  %v2273_v32 = vsub.s32 3, %v61_v22 }
   0x7   :  { %vm92_vm1 = vcmp.lt.s32.totalorder %v2260_v24, 16  ;;  %v2284_v36 = vsub.s32 2, %v61_v22  ;;  %vm132_vm2 = vcmp.lt.s32.totalorder %v2260_v24, 15  ;;  %vm172_vm3 = vcmp.lt.s32.totalorder %v2260_v24, 1 }
   0x8   :  { %v2277_v33 = vrot.slane %v58_v27, %v2262_v26  ;;  %v2280_v34 = vrot.slane %v1794_v28, %v2262_v26  ;;  %v2287_v39 = vrot.slane %v58_v27, %v2271_v31  ;;  %v2292_v41 = vrot.slane %v1794_v28, %v2271_v31 }
   0x9   :  { %v2295_v42 = vrot.slane %v58_v27, %v2273_v32  ;;  %v2298_v43 = vrot.slane %v1794_v28, %v2284_v36  ;;  %v2305_v47 = vrot.slane %v1794_v28, %v2273_v32  ;;  %v2312_v50 = vrot.slane %v58_v27, %v2284_v36 }
   0xa   :  { %vm212_vm4 = vcmp.lt.s32.totalorder %v2260_v24, 127  ;;  %vm252_vm5 = vcmp.lt.s32.totalorder %v2260_v24, 113  ;;  %vm292_vm6 = vcmp.lt.s32.totalorder %v2260_v24, 112  ;;  %vm332_vm7 = vcmp.lt.s32.totalorder %v2260_v24, 111  ;;  %v1255_v24 = vld [vmem:[%s3145_s1 + $0x10] sm:$0xff] }
  0x81   :  { %v27_v7 = vpop.permute.xlu0 %26 }
  0x82   :  { %v29_v8 = vmul.f32 %v27_v7, %v2143_v2  ;;  %v31_v9 = vmul.f32 %v27_v7, %v2153_v4  ;;  %v30_v13 = vmul.f32 %v27_v7, %v2148_v3  ;;  %v32_v15 = vmul.f32 %v27_v7, %v2158_v5 }
  0x85   :  { %v37_v10 = vpop.permute.xlu0 %36 }
  0x86   :  { %v2181_v11 = vadd.f32 %v37_v10, %v29_v8  ;;  %v2183_v12 = vadd.f32 %v37_v10, %v31_v9  ;;  %v2190_v14 = vadd.f32 %v37_v10, %v30_v13  ;;  %v2197_v16 = vadd.f32 %v37_v10, %v32_v15  ;;  %v1795_v8 = vld [vmem:[%s3148_s2 + $0x2] ss:$8 sm:$0xf]  ;;  %v1796_v9 = vld [vmem:[%s3148_s2 + $0x3] ss:$8 sm:$0xf] }
  0x87   :  { %v2334_v15 = vrot.slane %v1795_v8, %v2262_v26  ;;  %v2354_v28 = vrot.slane %v1796_v9, %v2271_v31 }
  0x88   :  { %47 = vrot.lane.b32.xlu0 %v2183_v12, %s2096_s12  ;;  %43 = vrot.lane.b32.xlu1 %v2181_v11, %s2096_s12 }
  0x8c   :  { %84 = vrot.lane.b32.xlu0 %v2181_v11, %s2097_s13  ;;  %45 = vrot.lane.b32.xlu1 %v2190_v14, %s2096_s12 }
  0x90   :  { %88 = vrot.lane.b32.xlu0 %v2183_v12, %s2097_s13  ;;  %49 = vrot.lane.b32.xlu1 %v2197_v16, %s2096_s12 }
  0x94   :  { %124 = vrot.lane.b32.xlu0 %v2181_v11, %s2098_s14  ;;  %86 = vrot.lane.b32.xlu1 %v2190_v14, %s2097_s13 }
  0x98   :  { %128 = vrot.lane.b32.xlu0 %v2183_v12, %s2098_s14  ;;  %90 = vrot.lane.b32.xlu1 %v2197_v16, %s2097_s13 }
  0x9c   :  { %164 = vrot.lane.b32.xlu0 %v2181_v11, %s2099_s15  ;;  %126 = vrot.lane.b32.xlu1 %v2190_v14, %s2098_s14 }
  0xa0   :  { %168 = vrot.lane.b32.xlu0 %v2183_v12, %s2099_s15  ;;  %130 = vrot.lane.b32.xlu1 %v2197_v16, %s2098_s14 }
  0xa4   :  { %204 = vrot.lane.b32.xlu0 %v2181_v11, %s2100_s16  ;;  %166 = vrot.lane.b32.xlu1 %v2190_v14, %s2099_s15 }
  0xa8   :  { %208 = vrot.lane.b32.xlu0 %v2183_v12, %s2100_s16  ;;  %170 = vrot.lane.b32.xlu1 %v2197_v16, %s2099_s15 }
  0xac   :  { %244 = vrot.lane.b32.xlu0 %v2181_v11, %s2101_s17  ;;  %206 = vrot.lane.b32.xlu1 %v2190_v14, %s2100_s16 }
  0xb0   :  { %248 = vrot.lane.b32.xlu0 %v2183_v12, %s2101_s17  ;;  %210 = vrot.lane.b32.xlu1 %v2197_v16, %s2100_s16 }
  0xb4   :  { %284 = vrot.lane.b32.xlu0 %v2181_v11, %s2102_s18  ;;  %246 = vrot.lane.b32.xlu1 %v2190_v14, %s2101_s17 }
  0xb8   :  { %288 = vrot.lane.b32.xlu0 %v2183_v12, %s2102_s18  ;;  %250 = vrot.lane.b32.xlu1 %v2197_v16, %s2101_s17 }
  0xbc   :  { %324 = vrot.lane.b32.xlu0 %v2181_v11, %s2104_s19  ;;  %286 = vrot.lane.b32.xlu1 %v2190_v14, %s2102_s18 }
  0xc0   :  { %328 = vrot.lane.b32.xlu0 %v2183_v12, %s2104_s19  ;;  %290 = vrot.lane.b32.xlu1 %v2197_v16, %s2102_s18 }
  0xc4   :  { %368 = vperm.xlu0 %2089, %v365_v18   ;;  %326 = vrot.lane.b32.xlu1 %v2190_v14, %s2104_s19  ;;  %v2338_v18 = vrot.slane %v1796_v9, %v2262_v26 }
  0xc8   :  { %330 = vrot.lane.b32.xlu1 %v2197_v16, %s2104_s19 }
  0xfa   :  { %v48_v20 = vpop.permute.xlu0 %47  ;;  %v44_v21 = vpop.permute.xlu1 %43 }
  0xfe   :  { %v85_v23 = vpop.permute.xlu0 %84  ;;  %v46_v25 = vpop.permute.xlu1 %45 }
  0xff   :  { %v56_v35 = vsel %vm53_vm0, %v44_v21, %v46_v25  ;;  %v55_v51 = vsel %vm53_vm0, %v46_v25, %v48_v20  ;;  %v2349_v25 = vrot.slane %v1796_v9, %v2284_v36 }
 0x100   :  { %v81_v45 = vmul.f32 %v2277_v33, %v56_v35  ;;  %v82_v62 = vmul.f32 %v2312_v50, %v55_v51 }
 0x102   :  { %v89_v29 = vpop.permute.xlu0 %88  ;;  %v50_v30 = vpop.permute.xlu1 %49 }
 0x103   :  { %v57_v48 = vsel %vm53_vm0, %v50_v30, %v44_v21  ;;  %v54_v49 = vsel %vm53_vm0, %v48_v20, %v50_v30  ;;  %v2343_v20 = vrot.slane %v1795_v8, %v2271_v31 }
 0x104   :  { %v80_v58 = vmul.f32 %v2287_v39, %v57_v48  ;;  %v83_v60 = vmul.f32 %v2295_v42, %v54_v49 }
 0x106   :  { %v125_v37 = vpop.permute.xlu0 %124  ;;  %v87_v38 = vpop.permute.xlu1 %86 }
 0x107   :  { %v95_v40 = vsel %vm92_vm1, %v85_v23, %v87_v38  ;;  %v94_v44 = vsel %vm92_vm1, %v87_v38, %v89_v29 }
 0x108   :  { %v121_v46 = vmul.f32 %v2280_v34, %v95_v40  ;;  %v122_v57 = vmul.f32 %v2298_v43, %v94_v44  ;;  %v2364_v40 = vrot.slane %v1796_v9, %v2273_v32  ;;  %v2367_v44 = vrot.slane %v1795_v8, %v2284_v36 }
 0x10a   :  { %v129_v52 = vpop.permute.xlu0 %128  ;;  %v91_v53 = vpop.permute.xlu1 %90  ;;  %v1898_v54 = vpack.c.bf16 %v121_v46, %v81_v45  ;;  %v1916_v7 = vpack.c.bf16 %v122_v57, %v82_v62 }
 0x10b   :  { %v96_v55 = vsel %vm92_vm1, %v91_v53, %v85_v23  ;;  %v93_v56 = vsel %vm92_vm1, %v89_v29, %v91_v53  ;;  %v2346_v23 = vrot.slane %v1795_v8, %v2273_v32  ;;  %v1797_v29 = vld [vmem:[%s3148_s2 + $0x5] ss:$8 sm:$0xf] }
 0x10c   :  { %1899 = vmatprep.subr.bf16.mxu0 %v1898_v54  ;;  %v120_v59 = vmul.f32 %v2292_v41, %v96_v55  ;;  %v123_v61 = vmul.f32 %v2305_v47, %v93_v56  ;;  %v2377_v54 = vrot.slane %v1797_v29, %v2271_v31  ;;  %v2397_v9 = vrot.slane %v1797_v29, %v2284_v36 }
 0x10e   :  { %v165_v63 = vpop.permute.xlu0 %164  ;;  %v127_v0 = vpop.permute.xlu1 %126  ;;  %v1900_v1 = vpack.c.bf16 %v120_v59, %v80_v58  ;;  %v1914_v6 = vpack.c.bf16 %v123_v61, %v83_v60 }
 0x10f   :  { %v135_v19 = vsel %vm132_vm2, %v125_v37, %v127_v0  ;;  %v134_v48 = vsel %vm132_vm2, %v127_v0, %v129_v52 }
 0x110   :  { %1901 = vmatpush1.bf16.msra.mxu0 %v1900_v1  ;;  %1915 = vmatprep.subr.bf16.mxu1 %v1914_v6  ;;  %v161_v30 = vmul.f32 %v2334_v15, %v135_v19  ;;  %v162_v61 = vmul.f32 %v2367_v44, %v134_v48  ;;  %v2402_v19 = vrot.slane %v1797_v29, %v2273_v32 }
 0x111   :  { %1917 = vmatpush1.bf16.msra.mxu1 %v1916_v7 }
 0x112   :  { %v169_v10 = vpop.permute.xlu0 %168  ;;  %v131_v13 = vpop.permute.xlu1 %130 }
 0x113   :  { %v133_v45 = vsel %vm132_vm2, %v129_v52, %v131_v13  ;;  %v136_v46 = vsel %vm132_vm2, %v131_v13, %v125_v37  ;;  %v2385_v37 = vrot.slane %v1797_v29, %v2262_v26 }
 0x114   :  { %v160_v52 = vmul.f32 %v2343_v20, %v136_v46  ;;  %v163_v58 = vmul.f32 %v2346_v23, %v133_v45 }
 0x116   :  { %v205_v21 = vpop.permute.xlu0 %204  ;;  %v167_v22 = vpop.permute.xlu1 %166 }
 0x117   :  { %v175_v27 = vsel %vm172_vm3, %v165_v63, %v167_v22  ;;  %v174_v35 = vsel %vm172_vm3, %v167_v22, %v169_v10 }
 0x118   :  { %v201_v38 = vmul.f32 %v2338_v18, %v175_v27  ;;  %v202_v55 = vmul.f32 %v2349_v25, %v174_v35 }
 0x11a   :  { %v209_v49 = vpop.permute.xlu0 %208  ;;  %v171_v51 = vpop.permute.xlu1 %170  ;;  %v1902_v53 = vpack.c.bf16 %v201_v38, %v161_v30  ;;  %v1920_v8 = vpack.c.bf16 %v202_v55, %v162_v61 }
 0x11b   :  { %v173_v56 = vsel %vm172_vm3, %v169_v10, %v171_v51  ;;  %v176_v57 = vsel %vm172_vm3, %v171_v51, %v165_v63 }
 0x11c   :  { %v200_v59 = vmul.f32 %v2354_v28, %v176_v57  ;;  %v203_v60 = vmul.f32 %v2364_v40, %v173_v56  ;;  %1903 = vmatprep.subr.bf16.mxu0 %v1902_v53 }
 0x11e   :  { %v245_v62 = vpop.permute.xlu0 %244  ;;  %v207_v0 = vpop.permute.xlu1 %206  ;;  %v1904_v1 = vpack.c.bf16 %v200_v59, %v160_v52  ;;  %v1918_v6 = vpack.c.bf16 %v203_v60, %v163_v58 }
 0x11f   :  { %v214_v63 = vsel %vm212_vm4, %v207_v0, %v209_v49  ;;  %v215_v7 = vsel %vm212_vm4, %v205_v21, %v207_v0 }
 0x120   :  { %v240_v10 = vmul.f32 %v2377_v54, %v215_v7  ;;  %v241_v13 = vmul.f32 %v2385_v37, %v214_v63  ;;  %1905 = vmatpush1.bf16.msra.mxu0 %v1904_v1  ;;  %1919 = vmatprep.subr.bf16.mxu1 %v1918_v6 }
 0x121   :  { %1921 = vmatpush1.bf16.msra.mxu1 %v1920_v8 }
 0x122   :  { %v249_v22 = vpop.permute.xlu0 %248  ;;  %v211_v27 = vpop.permute.xlu1 %210  ;;  %v1906_v30 = vpack.c.bf16 %v241_v13, %v2190_v14  ;;  %v1908_v35 = vpack.c.bf16 %v240_v10, %v2181_v11  ;;  %v1798_v11 = vld [vmem:[%s3148_s2 + $0x6] ss:$8 sm:$0xf] }
 0x123   :  { %v213_v38 = vsel %vm212_vm4, %v209_v49, %v211_v27  ;;  %v216_v45 = vsel %vm212_vm4, %v211_v27, %v205_v21  ;;  %v1799_v21 = vld [vmem:[%s3148_s2 + $0x7] ss:$8 sm:$0xf]  ;;  %v2422_v56 = vrot.slane %v1798_v11, %v2271_v31  ;;  %v2439_v59 = vrot.slane %v1798_v11, %v2284_v36 }
 0x124   :  { %v242_v46 = vmul.f32 %v2397_v9, %v213_v38  ;;  %v243_v48 = vmul.f32 %v2402_v19, %v216_v45  ;;  %1907 = vmatprep.subr.bf16.mxu0 %v1906_v30  ;;  %v2432_v57 = vrot.slane %v1799_v21, %v2262_v26  ;;  %v2442_v60 = vrot.slane %v1798_v11, %v2273_v32  ;;  %v1800_v30 = vld [vmem:[%s3148_s2 + $0x20] ss:$8 sm:$0xf] }
 0x125   :  { %1909 = vmatpush1.bf16.msra.mxu0 %v1908_v35  ;;  %v2449_v6 = vrot.slane %v1799_v21, %v2284_v36  ;;  %v2452_v63 = vrot.slane %v1799_v21, %v2273_v32 }
 0x126   :  { %v285_v29 = vpop.permute.xlu0 %284  ;;  %v247_v51 = vpop.permute.xlu1 %246  ;;  %v1922_v53 = vpack.c.bf16 %v243_v48, %v2197_v16  ;;  %v1924_v14 = vpack.c.bf16 %v242_v46, %v2183_v12  ;;  %v2425_v16 = vrot.slane %v1798_v11, %v2262_v26  ;;  %v2429_v12 = vrot.slane %v1799_v21, %v2271_v31 }
 0x127   :  { %v254_v52 = vsel %vm252_vm5, %v247_v51, %v249_v22  ;;  %v255_v58 = vsel %vm252_vm5, %v245_v62, %v247_v51  ;;  %v2474_v11 = vrot.slane %v1800_v30, %v2262_v26 }
 0x128   :  { %1923 = vmatprep.subr.bf16.mxu1 %v1922_v53  ;;  %v280_v7 = vmul.f32 %v2422_v56, %v255_v58  ;;  %v281_v8 = vmul.f32 %v2425_v16, %v254_v52 }
 0x129   :  { %1925 = vmatpush1.bf16.msra.mxu1 %v1924_v14  ;;  %v2471_v14 = vrot.slane %v1800_v30, %v2271_v31 }
 0x12a   :  { %v289_v49 = vpop.permute.xlu0 %288  ;;  %v251_v55 = vpop.permute.xlu1 %250 }
 0x12b   :  { %v253_v35 = vsel %vm252_vm5, %v249_v22, %v251_v55  ;;  %v256_v38 = vsel %vm252_vm5, %v251_v55, %v245_v62 }
 0x12c   :  { %v282_v22 = vmul.f32 %v2439_v59, %v253_v35  ;;  %v283_v62 = vmul.f32 %v2442_v60, %v256_v38 }
 0x12e   :  { %v287_v61 = vpop.permute.xlu1 %286  ;;  %v325_v10 = vpop.permute.xlu0 %324 }
 0x12f   :  { %v294_v0 = vsel %vm292_vm6, %v287_v61, %v289_v49  ;;  %v295_v1 = vsel %vm292_vm6, %v285_v29, %v287_v61 }
 0x130   :  { %v320_v13 = vmul.f32 %v2429_v12, %v295_v1  ;;  %v321_v27 = vmul.f32 %v2432_v57, %v294_v0  ;;  %v2487_v1 = vrot.slane %v1800_v30, %v2284_v36 }
 0x132   :  { %v291_v45 = vpop.permute.xlu1 %290  ;;  %v1910_v46 = vpack.c.bf16 %v321_v27, %v281_v8  ;;  %v1912_v48 = vpack.c.bf16 %v320_v13, %v280_v7  ;;  %v2490_v7 = vrot.slane %v1800_v30, %v2273_v32  ;;  %v364_v8 = vld [vmem:[%s3145_s1] sm:$0xff]  ;;  %v530_v30 = vld [vmem:[%s3145_s1 + $0x48] sm:$0xff] }
 0x133   :  { %v293_v51 = vsel %vm292_vm6, %v289_v49, %v291_v45  ;;  %v296_v53 = vsel %vm292_vm6, %v291_v45, %v285_v29  ;;  %v329_v49 = vpop.permute.xlu0 %328  ;;  %533 = vperm.xlu1 %2090, %v530_v30  }
 0x134   :  { %v322_v21 = vmul.f32 %v2449_v6, %v293_v51  ;;  %v323_v55 = vmul.f32 %v2452_v63, %v296_v53  ;;  %1911 = vmatprep.subr.bf16.mxu0 %v1910_v46 }
 0x135   :  { %1913 = vmatpush1.bf16.msra.mxu0 %v1912_v48 }
 0x136   :  { %v327_v52 = vpop.permute.xlu1 %326  ;;  %v1926_v58 = vpack.c.bf16 %v323_v55, %v283_v62  ;;  %v1928_v29 = vpack.c.bf16 %v322_v21, %v282_v22 }
 0x137   :  { %v334_v31 = vsel %vm332_vm7, %v327_v52, %v329_v49  ;;  %v335_v26 = vsel %vm332_vm7, %v325_v10, %v327_v52 }
 0x138   :  { %v360_v61 = vmul.f32 %v2471_v14, %v335_v26  ;;  %v361_v0 = vmul.f32 %v2474_v11, %v334_v31  ;;  %1927 = vmatprep.subr.bf16.mxu1 %v1926_v58 }
 0x139   :  { %1929 = vmatpush1.bf16.msra.mxu1 %v1928_v29 }
 0x13a   :  { %391 = vmatprep.subr.mxu0 %v361_v0  ;;  %v331_v13 = vpop.permute.xlu1 %330  ;;  %v529_v0 = vld [vmem:[%s3145_s1 + $0x18] sm:$0xff] }
 0x13b   :  { %v333_v27 = vsel %vm332_vm7, %v329_v49, %v331_v13  ;;  %v336_v35 = vsel %vm332_vm7, %v331_v13, %v325_v10  ;;  %392 = vmatpush1.msra.mxu0 %v360_v61 }
 0x13c   :  { %v362_v36 = vmul.f32 %v2487_v1, %v333_v27  ;;  %v363_v32 = vmul.f32 %v2490_v7, %v336_v35  ;;  %1801 = vmatmul.mubr.msk.f32.vlgmr.msra.gmra.mrb[0].mxu0 %vm371_vm8, %v364_v8 }
 0x13d   :  { %604 = vmatprep.mubr.f32.mxu0 %v2103_v17 }
 0x13e   :  { %462 = vmatprep.subr.mxu1 %v363_v32 }
 0x13f   :  { %463 = vmatpush1.msra.mxu1 %v362_v36 }
 0x140   :  { %1802 = vmatmul.mubr.msk.f32.vlgmr.msra.gmra.mrb[0].mxu1 %vm371_vm8, %v364_v8 }
 0x141   :  { %675 = vmatprep.mubr.f32.mxu1 %v2103_v17 }
 0x143   :  { %v369_v10 = vpop.permute.xlu0 %368 }
 0x20f   :  { %v441_v38 = vpop.f32.mrb[0].mxu0 }
 0x210   :  { %v442_v45 = vadd.f32 %v441_v38, %v369_v10  ;;  %v443_v46 = vpop.f32.mrb[1].mxu0  ;;  %v811_v38 = vld [vmem:[%s3145_s1 + $0x50] sm:$0xff] }
 0x211   :  { %v444_v48 = vadd.f32 %v443_v46, %v369_v10 }
 0x212   :  { %vm517_vm9 = vcmp.ge.f32.partialorder %v442_v45, 0.0  ;;  %v521_v51 = vmul.f32 0.01, %v442_v45 }
 0x213   :  { %vm518_vm10 = vcmp.ge.f32.partialorder %v444_v48, 0.0  ;;  %v522_v53 = vmul.f32 0.01, %v444_v48  ;;  %v512_v22 = vpop.f32.mrb[0].mxu1 }
 0x214   :  { %v525_v62 = vsel %vm517_vm9, %v442_v45, %v521_v51  ;;  %v513_v21 = vadd.f32 %v512_v22, %v369_v10  ;;  %v514_v55 = vpop.f32.mrb[1].mxu1  ;;  %v975_v45 = vld [vmem:[%s3145_s1 + $0x58] sm:$0xff] }
 0x215   :  { %v515_v49 = vadd.f32 %v514_v55, %v369_v10  ;;  %v526_v52 = vsel %vm518_vm10, %v444_v48, %v522_v53  ;;  %v2512_v31 = vpack.c.bf16 %v525_v62, %v2143_v2  ;;  %v534_v2 = vpop.permute.xlu1 %533 }
 0x216   :  { %vm519_vm11 = vcmp.ge.f32.partialorder %v513_v21, 0.0  ;;  %v523_v58 = vmul.f32 0.01, %v513_v21  ;;  %v2509_v29 = vpack.c.bf16 %v526_v52, %v2148_v3 }
 0x217   :  { %vm520_vm12 = vcmp.ge.f32.partialorder %v515_v49, 0.0  ;;  %v524_v26 = vmul.f32 0.01, %v515_v49 }
 0x218   :  { %v527_v61 = vsel %vm519_vm11, %v513_v21, %v523_v58  ;;  %1931 = vmatprep.subr.bf16.mxu0 %v2509_v29  ;;  %vm981_vm11 = vcmask 195584  }
 0x219   :  { %1933 = vmatpush1.bf16.msra.mxu0 %v2512_v31  ;;  %v528_v8 = vsel %vm520_vm12, %v515_v49, %v524_v26  ;;  %v2523_v3 = vpack.c.bf16 %v527_v61, %v2153_v4 }
 0x21a   :  { %v2520_v13 = vpack.c.bf16 %v528_v8, %v2158_v5 }
 0x21c   :  { %1803 = vmatmul.mubr.msk.f32.vlgmr.msra.gmra.mrb[2].mxu0 %vm536_vm13, %v529_v0  ;;  %1935 = vmatprep.subr.bf16.mxu1 %v2520_v13 }
 0x21d   :  { %1937 = vmatpush1.bf16.msra.mxu1 %v2523_v3  ;;  %884 = vmatprep.mubr.f32.mxu0 %v2103_v17 }
 0x220   :  { %1804 = vmatmul.mubr.msk.f32.vlgmr.msra.gmra.mrb[2].mxu1 %vm536_vm13, %v529_v0 }
 0x221   :  { %955 = vmatprep.mubr.f32.mxu1 %v2103_v17 }
 0x2ef   :  { %v606_v27 = vpop.f32.mrb[2].mxu0 }
 0x2f0   :  { %v2531_v35 = vadd.f32 %v606_v27, %v534_v2  ;;  %v608_v5 = vpop.f32.mrb[3].mxu0 }
 0x2f1   :  { %v2533_v36 = vadd.f32 %v608_v5, %v534_v2 }
 0x2f2   :  { %682 = vrot.lane.b32.xlu0 %v2531_v35, %s2096_s12 }
 0x2f3   :  { %v677_v4 = vpop.f32.mrb[2].mxu1  ;;  %684 = vrot.lane.b32.xlu1 %v2533_v36, %s2096_s12 }
 0x2f4   :  { %v2539_v32 = vadd.f32 %v677_v4, %v534_v2  ;;  %v679_v30 = vpop.f32.mrb[3].mxu1 }
 0x2f5   :  { %v2541_v10 = vadd.f32 %v679_v30, %v534_v2 }
 0x2f6   :  { %686 = vrot.lane.b32.xlu0 %v2539_v32, %s2096_s12 }
 0x2f7   :  { %688 = vrot.lane.b32.xlu1 %v2541_v10, %s2096_s12 }
 0x2fa   :  { %698 = vrot.lane.b32.xlu0 %v2531_v35, %s2097_s13 }
 0x2fb   :  { %700 = vrot.lane.b32.xlu1 %v2533_v36, %s2097_s13 }
 0x2fe   :  { %702 = vrot.lane.b32.xlu0 %v2539_v32, %s2097_s13 }
 0x2ff   :  { %704 = vrot.lane.b32.xlu1 %v2541_v10, %s2097_s13 }
 0x302   :  { %714 = vrot.lane.b32.xlu0 %v2531_v35, %s2098_s14 }
 0x303   :  { %716 = vrot.lane.b32.xlu1 %v2533_v36, %s2098_s14 }
 0x306   :  { %718 = vrot.lane.b32.xlu0 %v2539_v32, %s2098_s14 }
 0x307   :  { %720 = vrot.lane.b32.xlu1 %v2541_v10, %s2098_s14 }
 0x30a   :  { %730 = vrot.lane.b32.xlu0 %v2531_v35, %s2099_s15 }
 0x30b   :  { %732 = vrot.lane.b32.xlu1 %v2533_v36, %s2099_s15 }
 0x30e   :  { %734 = vrot.lane.b32.xlu0 %v2539_v32, %s2099_s15 }
 0x30f   :  { %736 = vrot.lane.b32.xlu1 %v2541_v10, %s2099_s15 }
 0x312   :  { %746 = vrot.lane.b32.xlu0 %v2531_v35, %s2100_s16 }
 0x313   :  { %748 = vrot.lane.b32.xlu1 %v2533_v36, %s2100_s16 }
 0x316   :  { %750 = vrot.lane.b32.xlu0 %v2539_v32, %s2100_s16 }
 0x317   :  { %752 = vrot.lane.b32.xlu1 %v2541_v10, %s2100_s16 }
 0x31a   :  { %762 = vrot.lane.b32.xlu0 %v2531_v35, %s2101_s17 }
 0x31b   :  { %764 = vrot.lane.b32.xlu1 %v2533_v36, %s2101_s17 }
 0x31e   :  { %766 = vrot.lane.b32.xlu0 %v2539_v32, %s2101_s17 }
 0x31f   :  { %768 = vrot.lane.b32.xlu1 %v2541_v10, %s2101_s17 }
 0x322   :  { %778 = vrot.lane.b32.xlu0 %v2531_v35, %s2102_s18 }
 0x323   :  { %780 = vrot.lane.b32.xlu1 %v2533_v36, %s2102_s18 }
 0x326   :  { %782 = vrot.lane.b32.xlu0 %v2539_v32, %s2102_s18 }
 0x327   :  { %784 = vrot.lane.b32.xlu1 %v2541_v10, %s2102_s18 }
 0x32a   :  { %794 = vrot.lane.b32.xlu0 %v2531_v35, %s2104_s19 }
 0x32b   :  { %796 = vrot.lane.b32.xlu1 %v2533_v36, %s2104_s19 }
 0x32e   :  { %798 = vrot.lane.b32.xlu0 %v2539_v32, %s2104_s19 }
 0x32f   :  { %800 = vrot.lane.b32.xlu1 %v2541_v10, %s2104_s19 }
 0x332   :  { %814 = vperm.xlu0 %2089, %v811_v38  }
 0x333   :  { %978 = vperm.xlu1 %2090, %v975_v45  }
 0x364   :  { %v683_v46 = vpop.permute.xlu0 %682 }
 0x365   :  { %v685_v48 = vpop.permute.xlu1 %684 }
 0x366   :  { %v692_v22 = vsel %vm53_vm0, %v683_v46, %v685_v48 }
 0x367   :  { %v695_v49 = vmul.f32 %v692_v22, %v2277_v33 }
 0x368   :  { %v687_v51 = vpop.permute.xlu0 %686 }
 0x369   :  { %v689_v53 = vpop.permute.xlu1 %688  ;;  %v691_v0 = vsel %vm53_vm0, %v685_v48, %v687_v51 }
 0x36a   :  { %v690_v58 = vsel %vm53_vm0, %v687_v51, %v689_v53  ;;  %v693_v26 = vsel %vm53_vm0, %v689_v53, %v683_v46  ;;  %v696_v51 = vmul.f32 %v691_v0, %v2312_v50 }
 0x36b   :  { %v694_v38 = vmul.f32 %v693_v26, %v2287_v39  ;;  %v697_v45 = vmul.f32 %v690_v58, %v2295_v42 }
 0x36c   :  { %v699_v62 = vpop.permute.xlu0 %698 }
 0x36d   :  { %v701_v21 = vpop.permute.xlu1 %700 }
 0x36e   :  { %v708_v55 = vsel %vm92_vm1, %v699_v62, %v701_v21 }
 0x36f   :  { %v711_v52 = vmul.f32 %v708_v55, %v2280_v34 }
 0x370   :  { %v703_v61 = vpop.permute.xlu0 %702 }
 0x371   :  { %v707_v8 = vsel %vm92_vm1, %v701_v21, %v703_v61  ;;  %v705_v2 = vpop.permute.xlu1 %704  ;;  %v1938_v27 = vpack.c.bf16 %v711_v52, %v695_v49 }
 0x372   :  { %v712_v5 = vmul.f32 %v707_v8, %v2298_v43  ;;  %v706_v4 = vsel %vm92_vm1, %v703_v61, %v705_v2  ;;  %v709_v30 = vsel %vm92_vm1, %v705_v2, %v699_v62 }
 0x373   :  { %v710_v46 = vmul.f32 %v709_v30, %v2292_v41  ;;  %v713_v48 = vmul.f32 %v706_v4, %v2305_v47  ;;  %1939 = vmatprep.subr.bf16.mxu0 %v1938_v27 }
 0x374   :  { %v715_v53 = vpop.permute.xlu0 %714  ;;  %v1956_v49 = vpack.c.bf16 %v712_v5, %v696_v51 }
 0x375   :  { %v1940_v22 = vpack.c.bf16 %v710_v46, %v694_v38  ;;  %v717_v21 = vpop.permute.xlu1 %716  ;;  %v1954_v55 = vpack.c.bf16 %v713_v48, %v697_v45 }
 0x376   :  { %v724_v58 = vsel %vm132_vm2, %v715_v53, %v717_v21 }
 0x377   :  { %1941 = vmatpush1.bf16.msra.mxu0 %v1940_v22  ;;  %1955 = vmatprep.subr.bf16.mxu1 %v1954_v55  ;;  %v727_v0 = vmul.f32 %v724_v58, %v2334_v15 }
 0x378   :  { %1957 = vmatpush1.bf16.msra.mxu1 %v1956_v49  ;;  %v719_v62 = vpop.permute.xlu0 %718 }
 0x379   :  { %v721_v52 = vpop.permute.xlu1 %720  ;;  %v723_v30 = vsel %vm132_vm2, %v717_v21, %v719_v62 }
 0x37a   :  { %v722_v27 = vsel %vm132_vm2, %v719_v62, %v721_v52  ;;  %v725_v5 = vsel %vm132_vm2, %v721_v52, %v715_v53  ;;  %v728_v62 = vmul.f32 %v723_v30, %v2367_v44 }
 0x37b   :  { %v726_v55 = vmul.f32 %v725_v5, %v2343_v20  ;;  %v729_v53 = vmul.f32 %v722_v27, %v2346_v23 }
 0x37c   :  { %v731_v26 = vpop.permute.xlu0 %730 }
 0x37d   :  { %v733_v61 = vpop.permute.xlu1 %732 }
 0x37e   :  { %v740_v8 = vsel %vm172_vm3, %v731_v26, %v733_v61 }
 0x37f   :  { %v743_v2 = vmul.f32 %v740_v8, %v2338_v18 }
 0x380   :  { %v735_v4 = vpop.permute.xlu0 %734 }
 0x381   :  { %v739_v38 = vsel %vm172_vm3, %v733_v61, %v735_v4  ;;  %v737_v45 = vpop.permute.xlu1 %736  ;;  %v1942_v46 = vpack.c.bf16 %v743_v2, %v727_v0 }
 0x382   :  { %v744_v48 = vmul.f32 %v739_v38, %v2349_v25  ;;  %v738_v51 = vsel %vm172_vm3, %v735_v4, %v737_v45  ;;  %v741_v22 = vsel %vm172_vm3, %v737_v45, %v731_v26 }
 0x383   :  { %v742_v49 = vmul.f32 %v741_v22, %v2354_v28  ;;  %v745_v21 = vmul.f32 %v738_v51, %v2364_v40  ;;  %1943 = vmatprep.subr.bf16.mxu0 %v1942_v46 }
 0x384   :  { %v747_v52 = vpop.permute.xlu0 %746  ;;  %v1960_v0 = vpack.c.bf16 %v744_v48, %v728_v62 }
 0x385   :  { %v1944_v58 = vpack.c.bf16 %v742_v49, %v726_v55  ;;  %v749_v61 = vpop.permute.xlu1 %748  ;;  %v1958_v8 = vpack.c.bf16 %v745_v21, %v729_v53 }
 0x386   :  { %v756_v2 = vsel %vm212_vm4, %v747_v52, %v749_v61 }
 0x387   :  { %1945 = vmatpush1.bf16.msra.mxu0 %v1944_v58  ;;  %1959 = vmatprep.subr.bf16.mxu1 %v1958_v8  ;;  %v758_v27 = vmul.f32 %v756_v2, %v2377_v54 }
 0x388   :  { %1961 = vmatpush1.bf16.msra.mxu1 %v1960_v0  ;;  %v751_v26 = vpop.permute.xlu0 %750 }
 0x389   :  { %v755_v5 = vsel %vm212_vm4, %v749_v61, %v751_v26  ;;  %v753_v4 = vpop.permute.xlu1 %752  ;;  %v1948_v55 = vpack.c.bf16 %v758_v27, %v2531_v35 }
 0x38a   :  { %v759_v30 = vmul.f32 %v755_v5, %v2385_v37  ;;  %v754_v38 = vsel %vm212_vm4, %v751_v26, %v753_v4  ;;  %v757_v45 = vsel %vm212_vm4, %v753_v4, %v747_v52 }
 0x38b   :  { %v760_v46 = vmul.f32 %v754_v38, %v2397_v9  ;;  %v761_v48 = vmul.f32 %v757_v45, %v2402_v19 }
 0x38c   :  { %v763_v51 = vpop.permute.xlu0 %762  ;;  %v1946_v22 = vpack.c.bf16 %v759_v30, %v2533_v36 }
 0x38d   :  { %v1964_v53 = vpack.c.bf16 %v760_v46, %v2539_v32  ;;  %v765_v49 = vpop.permute.xlu1 %764  ;;  %v1962_v21 = vpack.c.bf16 %v761_v48, %v2541_v10 }
 0x38e   :  { %1947 = vmatprep.subr.bf16.mxu0 %v1946_v22  ;;  %v772_v8 = vsel %vm252_vm5, %v763_v51, %v765_v49 }
 0x38f   :  { %1949 = vmatpush1.bf16.msra.mxu0 %v1948_v55  ;;  %1963 = vmatprep.subr.bf16.mxu1 %v1962_v21  ;;  %v774_v2 = vmul.f32 %v772_v8, %v2422_v56 }
 0x390   :  { %1965 = vmatpush1.bf16.msra.mxu1 %v1964_v53  ;;  %v767_v62 = vpop.permute.xlu0 %766 }
 0x391   :  { %v769_v52 = vpop.permute.xlu1 %768  ;;  %v771_v35 = vsel %vm252_vm5, %v765_v49, %v767_v62 }
 0x392   :  { %v770_v32 = vsel %vm252_vm5, %v767_v62, %v769_v52  ;;  %v773_v10 = vsel %vm252_vm5, %v769_v52, %v763_v51  ;;  %v775_v4 = vmul.f32 %v771_v35, %v2425_v16 }
 0x393   :  { %v776_v46 = vmul.f32 %v770_v32, %v2439_v59  ;;  %v777_v48 = vmul.f32 %v773_v10, %v2442_v60 }
 0x394   :  { %v779_v58 = vpop.permute.xlu0 %778 }
 0x395   :  { %v781_v61 = vpop.permute.xlu1 %780 }
 0x396   :  { %v788_v36 = vsel %vm292_vm6, %v779_v58, %v781_v61 }
 0x397   :  { %v790_v26 = vmul.f32 %v788_v36, %v2429_v12 }
 0x398   :  { %v783_v0 = vpop.permute.xlu0 %782 }
 0x399   :  { %v787_v27 = vsel %vm292_vm6, %v781_v61, %v783_v0  ;;  %v785_v5 = vpop.permute.xlu1 %784  ;;  %v1952_v49 = vpack.c.bf16 %v790_v26, %v774_v2 }
 0x39a   :  { %v791_v30 = vmul.f32 %v787_v27, %v2432_v57  ;;  %v786_v38 = vsel %vm292_vm6, %v783_v0, %v785_v5  ;;  %v789_v45 = vsel %vm292_vm6, %v785_v5, %v779_v58  ;;  %v810_v27 = vld [vmem:[%s3145_s1 + $0x8] sm:$0xff] }
 0x39b   :  { %v792_v51 = vmul.f32 %v786_v38, %v2449_v6  ;;  %v793_v22 = vmul.f32 %v789_v45, %v2452_v63 }
 0x39c   :  { %v795_v55 = vpop.permute.xlu0 %794  ;;  %v1950_v53 = vpack.c.bf16 %v791_v30, %v775_v4 }
 0x39d   :  { %v1968_v21 = vpack.c.bf16 %v792_v51, %v776_v46  ;;  %v797_v62 = vpop.permute.xlu1 %796  ;;  %v1966_v52 = vpack.c.bf16 %v793_v22, %v777_v48 }
 0x39e   :  { %1951 = vmatprep.subr.bf16.mxu0 %v1950_v53  ;;  %v804_v58 = vsel %vm332_vm7, %v795_v55, %v797_v62  ;;  %v974_v53 = vld [vmem:[%s3145_s1 + $0x20] sm:$0xff] }
 0x39f   :  { %1953 = vmatpush1.bf16.msra.mxu0 %v1952_v49  ;;  %1967 = vmatprep.subr.bf16.mxu1 %v1966_v52  ;;  %v806_v0 = vmul.f32 %v804_v58, %v2471_v14 }
 0x3a0   :  { %1969 = vmatpush1.bf16.msra.mxu1 %v1968_v21  ;;  %v799_v61 = vpop.permute.xlu0 %798 }
 0x3a1   :  { %v803_v8 = vsel %vm332_vm7, %v797_v62, %v799_v61  ;;  %v801_v36 = vpop.permute.xlu1 %800 }
 0x3a2   :  { %v807_v35 = vmul.f32 %v803_v8, %v2474_v11  ;;  %v802_v32 = vsel %vm332_vm7, %v799_v61, %v801_v36  ;;  %v805_v10 = vsel %vm332_vm7, %v801_v36, %v795_v55 }
 0x3a3   :  { %v808_v2 = vmul.f32 %v802_v32, %v2487_v1  ;;  %v809_v26 = vmul.f32 %v805_v10, %v2490_v7 }
 0x3a4   :  { %836 = vmatprep.subr.mxu0 %v807_v35 }
 0x3a5   :  { %837 = vmatpush1.msra.mxu0 %v806_v0  ;;  %907 = vmatprep.subr.mxu1 %v809_v26  ;;  %v1427_v26 = vld [vmem:[%s3145_s1 + $0x68] sm:$0xff] }
 0x3a6   :  { %1805 = vmatmul.mubr.msk.f32.vlgmr.msra.gmra.mrb[4].mxu0 %vm371_vm8, %v810_v27  ;;  %908 = vmatpush1.msra.mxu1 %v808_v2  ;;  %v1256_v2 = vld [vmem:[%s3145_s1 + $0x60] sm:$0xff] }
 0x3a7   :  { %1971 = vmatprep.subr.bf16.mxu0 %v2509_v29  ;;  %1806 = vmatmul.mubr.msk.f32.vlgmr.msra.gmra.mrb[4].mxu1 %vm371_vm8, %v810_v27  ;;  %v1447_v27 = vld [vmem:[%s3145_s1 + $0x78] sm:$0xff] }
 0x3a8   :  { %1973 = vmatpush1.bf16.msra.mxu0 %v2512_v31  ;;  %1975 = vmatprep.subr.bf16.mxu1 %v2520_v13 }
 0x3a9   :  { %1977 = vmatpush1.bf16.msra.mxu1 %v2523_v3  ;;  %1049 = vmatprep.mubr.f32.mxu0 %v2103_v17 }
 0x3aa   :  { %1120 = vmatprep.mubr.f32.mxu1 %v2103_v17 }
 0x3b1   :  { %v815_v5 = vpop.permute.xlu0 %814 }
 0x3b2   :  { %v979_v52 = vpop.permute.xlu1 %978 }
 0x479   :  { %v886_v4 = vpop.f32.mrb[4].mxu0 }
 0x47a   :  { %v887_v30 = vadd.f32 %v886_v4, %v815_v5  ;;  %v888_v38 = vpop.f32.mrb[5].mxu0  ;;  %v957_v45 = vpop.f32.mrb[4].mxu1  ;;  %v1448_v4 = vld [vmem:[%s3145_s1 + $0x80] sm:$0xff] }
 0x47b   :  { %v889_v46 = vadd.f32 %v888_v38, %v815_v5  ;;  %v958_v48 = vadd.f32 %v957_v45, %v815_v5  ;;  %v959_v29 = vpop.f32.mrb[5].mxu1 }
 0x47c   :  { %v966_v51 = vmul.f32 0.01, %v887_v30  ;;  %v960_v22 = vadd.f32 %v959_v29, %v815_v5  ;;  %vm962_vm14 = vcmp.ge.f32.partialorder %v887_v30, 0.0  ;;  %v1428_v5 = vld [vmem:[%s3145_s1 + $0x70] sm:$0xff] }
 0x47d   :  { %v967_v31 = vmul.f32 0.01, %v889_v46  ;;  %v968_v55 = vmul.f32 0.01, %v958_v48  ;;  %vm963_vm15 = vcmp.ge.f32.partialorder %v889_v46, 0.0  ;;  %vm964_vm9 = vcmp.ge.f32.partialorder %v958_v48, 0.0 }
 0x47e   :  { %v969_v13 = vmul.f32 0.01, %v960_v22  ;;  %vm965_vm10 = vcmp.ge.f32.partialorder %v960_v22, 0.0  ;;  %v970_v49 = vsel %vm962_vm14, %v887_v30, %v966_v51  ;;  %v1706_v30 = vld [vmem:[%s3145_s1 + $0x88] sm:$0xff] }
 0x47f   :  { %v971_v3 = vsel %vm963_vm15, %v889_v46, %v967_v31  ;;  %v972_v62 = vsel %vm964_vm9, %v958_v48, %v968_v55  ;;  %vm2106_vm9 = vmmov 0  }
 0x480   :  { %989 = vmatprep.subr.mxu0 %v971_v3  ;;  %v973_v21 = vsel %vm965_vm10, %v960_v22, %v969_v13 }
 0x481   :  { %990 = vmatpush1.msra.mxu0 %v970_v49  ;;  %1060 = vmatprep.subr.mxu1 %v973_v21 }
 0x482   :  { %1807 = vmatmul.mubr.msk.f32.vlgmr.msra.gmra.mrb[6].mxu0 %vm981_vm11, %v974_v53  ;;  %1061 = vmatpush1.msra.mxu1 %v972_v62 }
 0x483   :  { %1808 = vmatmul.mubr.msk.f32.vlgmr.msra.gmra.mrb[6].mxu1 %vm981_vm11, %v974_v53  ;;  %1329 = vmatprep.mubr.f32.mxu0 %v2103_v17 }
 0x484   :  { %1400 = vmatprep.mubr.f32.mxu1 %v2103_v17 }
 0x555   :  { %v1051_v58 = vpop.f32.mrb[6].mxu0 }
 0x556   :  { %v2725_v61 = vadd.f32 %v1051_v58, %v979_v52  ;;  %v1053_v8 = vpop.f32.mrb[7].mxu0  ;;  %v1122_v36 = vpop.f32.mrb[6].mxu1 }
 0x557   :  { %v2727_v35 = vadd.f32 %v1053_v8, %v979_v52  ;;  %v1124_v32 = vpop.f32.mrb[7].mxu1  ;;  %v2733_v10 = vadd.f32 %v1122_v36, %v979_v52 }
 0x558   :  { %1127 = vrot.lane.b32.xlu0 %v2725_v61, %s2096_s12  ;;  %v2735_v0 = vadd.f32 %v1124_v32, %v979_v52 }
 0x559   :  { %1129 = vrot.lane.b32.xlu1 %v2727_v35, %s2096_s12 }
 0x55c   :  { %1131 = vrot.lane.b32.xlu0 %v2733_v10, %s2096_s12 }
 0x55d   :  { %1133 = vrot.lane.b32.xlu1 %v2735_v0, %s2096_s12 }
 0x560   :  { %1143 = vrot.lane.b32.xlu0 %v2725_v61, %s2097_s13 }
 0x561   :  { %1145 = vrot.lane.b32.xlu1 %v2727_v35, %s2097_s13 }
 0x564   :  { %1147 = vrot.lane.b32.xlu0 %v2733_v10, %s2097_s13 }
 0x565   :  { %1149 = vrot.lane.b32.xlu1 %v2735_v0, %s2097_s13 }
 0x568   :  { %1159 = vrot.lane.b32.xlu0 %v2725_v61, %s2098_s14 }
 0x569   :  { %1161 = vrot.lane.b32.xlu1 %v2727_v35, %s2098_s14 }
 0x56c   :  { %1163 = vrot.lane.b32.xlu0 %v2733_v10, %s2098_s14 }
 0x56d   :  { %1165 = vrot.lane.b32.xlu1 %v2735_v0, %s2098_s14 }
 0x570   :  { %1175 = vrot.lane.b32.xlu0 %v2725_v61, %s2099_s15 }
 0x571   :  { %1177 = vrot.lane.b32.xlu1 %v2727_v35, %s2099_s15 }
 0x574   :  { %1179 = vrot.lane.b32.xlu0 %v2733_v10, %s2099_s15 }
 0x575   :  { %1181 = vrot.lane.b32.xlu1 %v2735_v0, %s2099_s15 }
 0x578   :  { %1191 = vrot.lane.b32.xlu0 %v2725_v61, %s2100_s16 }
 0x579   :  { %1193 = vrot.lane.b32.xlu1 %v2727_v35, %s2100_s16 }
 0x57c   :  { %1195 = vrot.lane.b32.xlu0 %v2733_v10, %s2100_s16 }
 0x57d   :  { %1197 = vrot.lane.b32.xlu1 %v2735_v0, %s2100_s16 }
 0x580   :  { %1207 = vrot.lane.b32.xlu0 %v2725_v61, %s2101_s17 }
 0x581   :  { %1209 = vrot.lane.b32.xlu1 %v2727_v35, %s2101_s17 }
 0x584   :  { %1211 = vrot.lane.b32.xlu0 %v2733_v10, %s2101_s17 }
 0x585   :  { %1213 = vrot.lane.b32.xlu1 %v2735_v0, %s2101_s17 }
 0x588   :  { %1223 = vrot.lane.b32.xlu0 %v2725_v61, %s2102_s18 }
 0x589   :  { %1225 = vrot.lane.b32.xlu1 %v2727_v35, %s2102_s18 }
 0x58c   :  { %1227 = vrot.lane.b32.xlu0 %v2733_v10, %s2102_s18 }
 0x58d   :  { %1229 = vrot.lane.b32.xlu1 %v2735_v0, %s2102_s18 }
 0x590   :  { %1239 = vrot.lane.b32.xlu0 %v2725_v61, %s2104_s19 }
 0x591   :  { %1241 = vrot.lane.b32.xlu1 %v2727_v35, %s2104_s19 }
 0x594   :  { %1243 = vrot.lane.b32.xlu0 %v2733_v10, %s2104_s19 }
 0x595   :  { %1245 = vrot.lane.b32.xlu1 %v2735_v0, %s2104_s19 }
 0x598   :  { %1259 = vperm.xlu0 %2089, %v1256_v2  }
 0x599   :  { %1431 = vperm.xlu1 %2090, %v1427_v26  }
 0x59c   :  { %1451 = vperm.xlu0 %2089, %v1447_v27  }
 0x59d   :  { %1436 = vperm.xlu1 %2090, %v1428_v5  }
 0x5a0   :  { %1456 = vperm.xlu0 %2089, %v1448_v4  }
 0x5a1   :  { %1709 = vperm.xlu1 %2090, %v1706_v30  }
 0x5ca   :  { %v1128_v38 = vpop.permute.xlu0 %1127 }
 0x5cb   :  { %v1130_v45 = vpop.permute.xlu1 %1129 }
 0x5cc   :  { %v1137_v29 = vsel %vm53_vm0, %v1128_v38, %v1130_v45 }
 0x5cd   :  { %v1140_v55 = vmul.f32 %v1137_v29, %v2277_v33 }
 0x5ce   :  { %v1132_v46 = vpop.permute.xlu0 %1131 }
 0x5cf   :  { %v1134_v48 = vpop.permute.xlu1 %1133  ;;  %v1136_v21 = vsel %vm53_vm0, %v1130_v45, %v1132_v46 }
 0x5d0   :  { %v1135_v3 = vsel %vm53_vm0, %v1132_v46, %v1134_v48  ;;  %v1138_v53 = vsel %vm53_vm0, %v1134_v48, %v1128_v38  ;;  %v1141_v27 = vmul.f32 %v1136_v21, %v2312_v50 }
 0x5d1   :  { %v1139_v36 = vmul.f32 %v1138_v53, %v2287_v39  ;;  %v1142_v32 = vmul.f32 %v1135_v3, %v2295_v42 }
 0x5d2   :  { %v1144_v51 = vpop.permute.xlu0 %1143 }
 0x5d3   :  { %v1146_v22 = vpop.permute.xlu1 %1145 }
 0x5d4   :  { %v1153_v31 = vsel %vm92_vm1, %v1144_v51, %v1146_v22 }
 0x5d5   :  { %v1156_v13 = vmul.f32 %v1153_v31, %v2280_v34 }
 0x5d6   :  { %v1148_v49 = vpop.permute.xlu0 %1147 }
 0x5d7   :  { %v1152_v62 = vsel %vm92_vm1, %v1146_v22, %v1148_v49  ;;  %v1150_v52 = vpop.permute.xlu1 %1149  ;;  %v1978_v58 = vpack.c.bf16 %v1156_v13, %v1140_v55 }
 0x5d8   :  { %v1157_v8 = vmul.f32 %v1152_v62, %v2298_v43  ;;  %v1151_v33 = vsel %vm92_vm1, %v1148_v49, %v1150_v52  ;;  %v1154_v34 = vsel %vm92_vm1, %v1150_v52, %v1144_v51 }
 0x5d9   :  { %v1155_v2 = vmul.f32 %v1154_v34, %v2292_v41  ;;  %v1158_v26 = vmul.f32 %v1151_v33, %v2305_v47  ;;  %1979 = vmatprep.subr.bf16.mxu0 %v1978_v58 }
 0x5da   :  { %v1160_v5 = vpop.permute.xlu0 %1159  ;;  %v1996_v38 = vpack.c.bf16 %v1157_v8, %v1141_v27 }
 0x5db   :  { %v1980_v4 = vpack.c.bf16 %v1155_v2, %v1139_v36  ;;  %v1162_v43 = vpop.permute.xlu1 %1161  ;;  %v1994_v30 = vpack.c.bf16 %v1158_v26, %v1142_v32 }
 0x5dc   :  { %v1169_v39 = vsel %vm132_vm2, %v1160_v5, %v1162_v43 }
 0x5dd   :  { %1981 = vmatpush1.bf16.msra.mxu0 %v1980_v4  ;;  %1995 = vmatprep.subr.bf16.mxu1 %v1994_v30  ;;  %v1172_v50 = vmul.f32 %v1169_v39, %v2334_v15 }
 0x5de   :  { %1997 = vmatpush1.bf16.msra.mxu1 %v1996_v38  ;;  %v1164_v45 = vpop.permute.xlu0 %1163 }
 0x5df   :  { %v1166_v46 = vpop.permute.xlu1 %1165  ;;  %v1168_v31 = vsel %vm132_vm2, %v1162_v43, %v1164_v45 }
 0x5e0   :  { %v1167_v29 = vsel %vm132_vm2, %v1164_v45, %v1166_v46  ;;  %v1170_v51 = vsel %vm132_vm2, %v1166_v46, %v1160_v5  ;;  %v1173_v58 = vmul.f32 %v1168_v31, %v2367_v44 }
 0x5e1   :  { %v1171_v49 = vmul.f32 %v1170_v51, %v2343_v20  ;;  %v1174_v21 = vmul.f32 %v1167_v29, %v2346_v23 }
 0x5e2   :  { %v1176_v42 = vpop.permute.xlu0 %1175 }
 0x5e3   :  { %v1178_v41 = vpop.permute.xlu1 %1177 }
 0x5e4   :  { %v1185_v47 = vsel %vm172_vm3, %v1176_v42, %v1178_v41 }
 0x5e5   :  { %v1188_v48 = vmul.f32 %v1185_v47, %v2338_v18 }
 0x5e6   :  { %v1180_v22 = vpop.permute.xlu0 %1179 }
 0x5e7   :  { %v1184_v55 = vsel %vm172_vm3, %v1178_v41, %v1180_v22  ;;  %v1182_v13 = vpop.permute.xlu1 %1181  ;;  %v1982_v3 = vpack.c.bf16 %v1188_v48, %v1172_v50 }
 0x5e8   :  { %v1189_v53 = vmul.f32 %v1184_v55, %v2349_v25  ;;  %v1183_v15 = vsel %vm172_vm3, %v1180_v22, %v1182_v13  ;;  %v1186_v18 = vsel %vm172_vm3, %v1182_v13, %v1176_v42 }
 0x5e9   :  { %v1187_v62 = vmul.f32 %v1186_v18, %v2354_v28  ;;  %v1190_v52 = vmul.f32 %v1183_v15, %v2364_v40  ;;  %1983 = vmatprep.subr.bf16.mxu0 %v1982_v3 }
 0x5ea   :  { %v1192_v8 = vpop.permute.xlu0 %1191  ;;  %v2000_v36 = vpack.c.bf16 %v1189_v53, %v1173_v58  ;;  %v1539_v58 = vld [vmem:[%s3149_s3 + $0x180] sm:$0xff] }
 0x5eb   :  { %v1984_v33 = vpack.c.bf16 %v1187_v62, %v1171_v49  ;;  %v1194_v25 = vpop.permute.xlu1 %1193  ;;  %v1998_v34 = vpack.c.bf16 %v1190_v52, %v1174_v21  ;;  %v1507_v49 = vld [vmem:[%s3149_s3 + $0x80] sm:$0xff]  ;;  %v1492_v21 = vld [vmem:[%s3149_s3 + $0x8] sm:$0xff] }
 0x5ec   :  { %v1201_v32 = vsel %vm212_vm4, %v1192_v8, %v1194_v25 }
 0x5ed   :  { %1985 = vmatpush1.bf16.msra.mxu0 %v1984_v33  ;;  %1999 = vmatprep.subr.bf16.mxu1 %v1998_v34  ;;  %v1203_v23 = vmul.f32 %v1201_v32, %v2377_v54  ;;  %v1523_v33 = vld [vmem:[%s3149_s3 + $0x100] sm:$0xff]  ;;  %v1524_v32 = vld [vmem:[%s3149_s3 + $0x108] sm:$0xff] }
 0x5ee   :  { %2001 = vmatpush1.bf16.msra.mxu1 %v2000_v36  ;;  %v1196_v20 = vpop.permute.xlu0 %1195 }
 0x5ef   :  { %v1200_v28 = vsel %vm212_vm4, %v1194_v25, %v1196_v20  ;;  %v1198_v40 = vpop.permute.xlu1 %1197  ;;  %v1988_v54 = vpack.c.bf16 %v1203_v23, %v2725_v61  ;;  %v1510_v23 = vld [vmem:[%s3149_s3 + $0x98] sm:$0xff] }
 0x5f0   :  { %v1204_v44 = vmul.f32 %v1200_v28, %v2385_v37  ;;  %v1199_v2 = vsel %vm212_vm4, %v1196_v20, %v1198_v40  ;;  %v1202_v26 = vsel %vm212_vm4, %v1198_v40, %v1192_v8  ;;  %v1540_v8 = vld [vmem:[%s3149_s3 + $0x188] sm:$0xff]  ;;  %v1509_v20 = vld [vmem:[%s3149_s3 + $0x90] sm:$0xff] }
 0x5f1   :  { %v1205_v27 = vmul.f32 %v1199_v2, %v2397_v9  ;;  %v1206_v5 = vmul.f32 %v1202_v26, %v2402_v19  ;;  %v1541_v2 = vld [vmem:[%s3149_s3 + $0x190] sm:$0xff]  ;;  %v1542_v26 = vld [vmem:[%s3149_s3 + $0x198] sm:$0xff] }
 0x5f2   :  { %v1208_v4 = vpop.permute.xlu0 %1207  ;;  %v1986_v43 = vpack.c.bf16 %v1204_v44, %v2727_v35 }
 0x5f3   :  { %v2004_v30 = vpack.c.bf16 %v1205_v27, %v2733_v10  ;;  %v1210_v38 = vpop.permute.xlu1 %1209  ;;  %v2002_v37 = vpack.c.bf16 %v1206_v5, %v2735_v0  ;;  %v1493_v5 = vld [vmem:[%s3149_s3 + $0x10] sm:$0xff] }
 0x5f4   :  { %1987 = vmatprep.subr.bf16.mxu0 %v1986_v43  ;;  %v1217_v19 = vsel %vm252_vm5, %v1208_v4, %v1210_v38  ;;  %v1525_v43 = vld [vmem:[%s3149_s3 + $0x110] sm:$0xff] }
 0x5f5   :  { %1989 = vmatpush1.bf16.msra.mxu0 %v1988_v54  ;;  %2003 = vmatprep.subr.bf16.mxu1 %v2002_v37  ;;  %v1219_v41 = vmul.f32 %v1217_v19, %v2422_v56  ;;  %v2046_v54 = vpack.c.bf16 %v1542_v26, %v1541_v2  ;;  %v1512_v37 = vld [vmem:[%s3149_s3 + $0xa8] sm:$0xff]  ;;  %v1503_v26 = vld [vmem:[%s3149_s3 + $0x60] sm:$0xff] }
 0x5f6   :  { %2005 = vmatpush1.bf16.msra.mxu1 %v2004_v30  ;;  %v1212_v45 = vpop.permute.xlu0 %1211  ;;  %v1526_v30 = vld [vmem:[%s3149_s3 + $0x118] sm:$0xff] }
 0x5f7   :  { %v1214_v46 = vpop.permute.xlu1 %1213  ;;  %v1216_v61 = vsel %vm252_vm5, %v1210_v38, %v1212_v45  ;;  %v1511_v38 = vld [vmem:[%s3149_s3 + $0xa0] sm:$0xff] }
 0x5f8   :  { %v1215_v10 = vsel %vm252_vm5, %v1212_v45, %v1214_v46  ;;  %v1218_v0 = vsel %vm252_vm5, %v1214_v46, %v1208_v4  ;;  %v1220_v29 = vmul.f32 %v1216_v61, %v2425_v16  ;;  %v1494_v4 = vld [vmem:[%s3149_s3 + $0x18] sm:$0xff]  ;;  %v1543_v45 = vld [vmem:[%s3149_s3 + $0x1a0] sm:$0xff]  ;;  %v1544_v46 = vld [vmem:[%s3149_s3 + $0x1a8] sm:$0xff]  ;;  %v2018_v19 = vpack.c.bf16 %v1512_v37, %v1511_v38 }
 0x5f9   :  { %v1221_v55 = vmul.f32 %v1215_v10, %v2439_v59  ;;  %v1222_v56 = vmul.f32 %v1218_v0, %v2442_v60  ;;  %v1496_v61 = vld [vmem:[%s3149_s3 + $0x28] sm:$0xff]  ;;  %v1527_v10 = vld [vmem:[%s3149_s3 + $0x120] sm:$0xff]  ;;  %v2050_v0 = vpack.c.bf16 %v1544_v46, %v1543_v45  ;;  %v1522_v38 = vld [vmem:[%s3149_s3 + $0xf8] sm:$0xff] }
 0x5fa   :  { %v1224_v39 = vpop.permute.xlu0 %1223  ;;  %v1505_v37 = vld [vmem:[%s3149_s3 + $0x70] sm:$0xff]  ;;  %v1506_v46 = vld [vmem:[%s3149_s3 + $0x78] sm:$0xff] }
 0x5fb   :  { %v1226_v9 = vpop.permute.xlu1 %1225 }
 0x5fc   :  { %v1233_v35 = vsel %vm292_vm6, %v1224_v39, %v1226_v9 }
 0x5fd   :  { %v1235_v47 = vmul.f32 %v1233_v35, %v2429_v12  ;;  %v1495_v35 = vld [vmem:[%s3149_s3 + $0x20] sm:$0xff] }
 0x5fe   :  { %v1228_v42 = vpop.permute.xlu0 %1227 }
 0x5ff   :  { %v1232_v50 = vsel %vm292_vm6, %v1226_v9, %v1228_v42  ;;  %v1230_v48 = vpop.permute.xlu1 %1229  ;;  %v1992_v15 = vpack.c.bf16 %v1235_v47, %v1219_v41  ;;  %v2048_v9 = vpack.c.bf16 %v1526_v30, %v1525_v43  ;;  %v1513_v41 = vld [vmem:[%s3149_s3 + $0xb0] sm:$0xff]  ;;  %v1514_v47 = vld [vmem:[%s3149_s3 + $0xb8] sm:$0xff] }
 0x600   :  { %v1236_v51 = vmul.f32 %v1232_v50, %v2432_v57  ;;  %v1231_v22 = vsel %vm292_vm6, %v1228_v42, %v1230_v48  ;;  %v1234_v31 = vsel %vm292_vm6, %v1230_v48, %v1224_v39  ;;  %v2016_v39 = vpack.c.bf16 %v1494_v4, %v1493_v5  ;;  %v1528_v42 = vld [vmem:[%s3149_s3 + $0x128] sm:$0xff]  ;;  %v1545_v50 = vld [vmem:[%s3149_s3 + $0x1b0] sm:$0xff]  ;;  %v1546_v48 = vld [vmem:[%s3149_s3 + $0x1b8] sm:$0xff] }
 0x601   :  { %v1237_v12 = vmul.f32 %v1231_v22, %v2449_v6  ;;  %v1238_v13 = vmul.f32 %v1234_v31, %v2452_v63  ;;  %v1508_v6 = vld [vmem:[%s3149_s3 + $0x88] sm:$0xff]  ;;  %v1491_v63 = vld [vmem:[%s3149_s3] sm:$0xff]  ;;  %v2022_v22 = vpack.c.bf16 %v1514_v47, %v1513_v41  ;;  %v1497_v31 = vld [vmem:[%s3149_s3 + $0x30] sm:$0xff] }
 0x602   :  { %v1240_v3 = vpop.permute.xlu0 %1239  ;;  %v1990_v53 = vpack.c.bf16 %v1236_v51, %v1220_v29  ;;  %v2010_v44 = vpack.c.bf16 %v1508_v6, %v1507_v49  ;;  %v2012_v27 = vpack.c.bf16 %v1492_v21, %v1491_v63  ;;  %v2020_v29 = vpack.c.bf16 %v1496_v61, %v1495_v35  ;;  %v1500_v49 = vld [vmem:[%s3149_s3 + $0x48] sm:$0xff]  ;;  %v1531_v63 = vld [vmem:[%s3149_s3 + $0x140] sm:$0xff]  ;;  %v1521_v30 = vld [vmem:[%s3149_s3 + $0xf0] sm:$0xff] }
 0x603   :  { %v2008_v16 = vpack.c.bf16 %v1237_v12, %v1221_v55  ;;  %v1242_v18 = vpop.permute.xlu1 %1241  ;;  %v2006_v57 = vpack.c.bf16 %v1238_v13, %v1222_v56  ;;  %v2052_v51 = vpack.c.bf16 %v1528_v42, %v1527_v10  ;;  %v1498_v55 = vld [vmem:[%s3149_s3 + $0x38] sm:$0xff]  ;;  %v1529_v56 = vld [vmem:[%s3149_s3 + $0x130] sm:$0xff]  ;;  %v2054_v12 = vpack.c.bf16 %v1546_v48, %v1545_v50  ;;  %v1548_v6 = vld [vmem:[%s3149_s3 + $0x1c8] sm:$0xff] }
 0x604   :  { %1991 = vmatprep.subr.bf16.mxu0 %v1990_v53  ;;  %v1249_v59 = vsel %vm332_vm7, %v1240_v3, %v1242_v18  ;;  %v1530_v13 = vld [vmem:[%s3149_s3 + $0x138] sm:$0xff]  ;;  %v1516_v53 = vld [vmem:[%s3149_s3 + $0xc8] sm:$0xff]  ;;  %v1535_v5 = vld [vmem:[%s3149_s3 + $0x160] sm:$0xff]  ;;  %v2038_v45 = vpack.c.bf16 %v1522_v38, %v1521_v30 }
 0x605   :  { %1993 = vmatpush1.bf16.msra.mxu0 %v1992_v15  ;;  %2007 = vmatprep.subr.bf16.mxu1 %v2006_v57  ;;  %v2024_v15 = vpack.c.bf16 %v1498_v55, %v1497_v31  ;;  %v1499_v57 = vld [vmem:[%s3149_s3 + $0x40] sm:$0xff]  ;;  %v1532_v21 = vld [vmem:[%s3149_s3 + $0x148] sm:$0xff]  ;;  %v1537_v61 = vld [vmem:[%s3149_s3 + $0x170] sm:$0xff] }
 0x606   :  { %2009 = vmatpush1.bf16.msra.mxu1 %v2008_v16  ;;  %v1244_v60 = vpop.permute.xlu0 %1243  ;;  %v2056_v16 = vpack.c.bf16 %v1530_v13, %v1529_v56  ;;  %v1536_v4 = vld [vmem:[%s3149_s3 + $0x168] sm:$0xff]  ;;  %v1538_v10 = vld [vmem:[%s3149_s3 + $0x178] sm:$0xff]  ;;  %v2091_v31 = vld [vmem:[%s3147_s4 + $0x20] sm:$0xff] }
 0x607   :  { %v1248_v62 = vsel %vm332_vm7, %v1242_v18, %v1244_v60  ;;  %v1246_v52 = vpop.permute.xlu1 %1245  ;;  %v2092_v56 = vld [vmem:[%s3147_s4 + $0x28] sm:$0xff] }
 0x608   :  { %v1252_v25 = vmul.f32 %v1248_v62, %v2474_v11  ;;  %v1247_v34 = vsel %vm332_vm7, %v1244_v60, %v1246_v52  ;;  %v1250_v36 = vsel %vm332_vm7, %v1246_v52, %v1240_v3  ;;  %v1251_v11 = vmul.f32 %v1249_v59, %v2471_v14  ;;  %v1515_v3 = vld [vmem:[%s3149_s3 + $0xc0] sm:$0xff] }
 0x609   :  { %v1253_v28 = vmul.f32 %v1247_v34, %v2487_v1  ;;  %v1254_v40 = vmul.f32 %v1250_v36, %v2490_v7  ;;  %v2042_v14 = vpack.c.bf16 %v1540_v8, %v1539_v58  ;;  %v2044_v1 = vpack.c.bf16 %v1524_v32, %v1523_v33  ;;  %v1547_v59 = vld [vmem:[%s3149_s3 + $0x1c0] sm:$0xff]  ;;  %v1517_v58 = vld [vmem:[%s3149_s3 + $0xd0] sm:$0xff]  ;;  %v1518_v8 = vld [vmem:[%s3149_s3 + $0xd8] sm:$0xff] }
 0x60a   :  { %1281 = vmatprep.subr.mxu0 %v1252_v25  ;;  %v2014_v7 = vpack.c.bf16 %v1510_v23, %v1509_v20  ;;  %v2026_v18 = vpack.c.bf16 %v1516_v53, %v1515_v3  ;;  %v2028_v60 = vpack.c.bf16 %v1500_v49, %v1499_v57  ;;  %v2058_v62 = vpack.c.bf16 %v1548_v6, %v1547_v59  ;;  %v1501_v25 = vld [vmem:[%s3149_s3 + $0x50] sm:$0xff]  ;;  %v1502_v34 = vld [vmem:[%s3149_s3 + $0x58] sm:$0xff] }
 0x60b   :  { %1282 = vmatpush1.msra.mxu0 %v1251_v11  ;;  %1352 = vmatprep.subr.mxu1 %v1254_v40  ;;  %v2060_v52 = vpack.c.bf16 %v1532_v21, %v1531_v63  ;;  %v2030_v33 = vpack.c.bf16 %v1518_v8, %v1517_v58  ;;  %v1549_v36 = vld [vmem:[%s3149_s3 + $0x1d0] sm:$0xff]  ;;  %v2032_v32 = vpack.c.bf16 %v1502_v34, %v1501_v25  ;;  %v1550_v20 = vld [vmem:[%s3149_s3 + $0x1d8] sm:$0xff] }
 0x60c   :  { %1809 = vmatmul.mubr.msk.f32.vlgmr.msra.gmra.mrb[8].mxu0 %vm371_vm8, %v1255_v24  ;;  %1353 = vmatpush1.msra.mxu1 %v1253_v28  ;;  %v1533_v23 = vld [vmem:[%s3149_s3 + $0x150] sm:$0xff]  ;;  %v1534_v11 = vld [vmem:[%s3149_s3 + $0x158] sm:$0xff]  ;;  %v2062_v28 = vpack.c.bf16 %v1550_v20, %v1549_v36 }
 0x60d   :  { %1810 = vmatmul.mubr.msk.f32.vlgmr.msra.gmra.mrb[8].mxu1 %vm371_vm8, %v1255_v24  ;;  %2011 = vmatprep.subr.bf16.mxu0 %v2010_v44  ;;  %v2064_v40 = vpack.c.bf16 %v1534_v11, %v1533_v23  ;;  %v1519_v24 = vld [vmem:[%s3149_s3 + $0xe0] sm:$0xff]  ;;  %v1520_v44 = vld [vmem:[%s3149_s3 + $0xe8] sm:$0xff]  ;;  %v2094_v6 = vld [vmem:[%s3147_s4 + $0x30] sm:$0xff] }
 0x60e   :  { %2013 = vmatpush3.bf16.msra.mxu0 %v2012_v27  ;;  %2043 = vmatprep.subr.bf16.mxu1 %v2042_v14  ;;  %v2034_v2 = vpack.c.bf16 %v1520_v44, %v1519_v24  ;;  %v1504_v27 = vld [vmem:[%s3149_s3 + $0x68] sm:$0xff]  ;;  %v1551_v14 = vld [vmem:[%s3149_s3 + $0x1e0] sm:$0xff] }
 0x60f   :  { %2045 = vmatpush3.bf16.msra.mxu1 %v2044_v1  ;;  %2015 = vmatprep.subr.bf16.mxu0 %v2014_v7  ;;  %v2036_v1 = vpack.c.bf16 %v1504_v27, %v1503_v26  ;;  %v1552_v7 = vld [vmem:[%s3149_s3 + $0x1e8] sm:$0xff] }
 0x610   :  { %2047 = vmatprep.subr.bf16.mxu1 %v2046_v54  ;;  %v2066_v43 = vpack.c.bf16 %v1552_v7, %v1551_v14  ;;  %v2068_v54 = vpack.c.bf16 %v1536_v4, %v1535_v5 }
 0x612   :  { %2017 = vmatpush3.bf16.msra.mxu0 %v2016_v39  ;;  %v1553_v39 = vld [vmem:[%s3149_s3 + $0x1f0] sm:$0xff] }
 0x613   :  { %2049 = vmatpush3.bf16.msra.mxu1 %v2048_v9  ;;  %2019 = vmatprep.subr.bf16.mxu0 %v2018_v19  ;;  %v1554_v9 = vld [vmem:[%s3149_s3 + $0x1f8] sm:$0xff]  ;;  %v2040_v19 = vpack.c.bf16 %v1506_v46, %v1505_v37 }
 0x614   :  { %2051 = vmatprep.subr.bf16.mxu1 %v2050_v0  ;;  %v2070_v35 = vpack.c.bf16 %v1554_v9, %v1553_v39  ;;  %v2072_v0 = vpack.c.bf16 %v1538_v10, %v1537_v61  ;;  %v2105_v9 = vmov 0.0|0.0  }
 0x616   :  { %2021 = vmatpush3.bf16.msra.mxu0 %v2020_v29 }
 0x617   :  { %2053 = vmatpush3.bf16.msra.mxu1 %v2052_v51  ;;  %2023 = vmatprep.subr.bf16.mxu0 %v2022_v22  ;;  %v1260_v42 = vpop.permute.xlu0 %1259 }
 0x618   :  { %2055 = vmatprep.subr.bf16.mxu1 %v2054_v12  ;;  %v1432_v41 = vpop.permute.xlu1 %1431 }
 0x61a   :  { %2025 = vmatpush3.bf16.msra.mxu0 %v2024_v15  ;;  %v2093_v15 = vld [vmem:[%s3147_s4 + $0x38] sm:$0xff] }
 0x61b   :  { %2057 = vmatpush3.bf16.msra.mxu1 %v2056_v16  ;;  %2027 = vmatprep.subr.bf16.mxu0 %v2026_v18  ;;  %v1452_v47 = vpop.permute.xlu0 %1451 }
 0x61c   :  { %2059 = vmatprep.subr.bf16.mxu1 %v2058_v62  ;;  %v1437_v50 = vpop.permute.xlu1 %1436 }
 0x61d   :  { %v1443_v55 = vmul.f32 %v2091_v31, %v1437_v50  ;;  %v1444_v12 = vmul.f32 %v2092_v56, %v1437_v50  ;;  %v1446_v16 = vmul.f32 %v2093_v15, %v1437_v50  ;;  %v1445_v63 = vmul.f32 %v2094_v6, %v1437_v50 }
 0x61e   :  { %2029 = vmatpush3.bf16.msra.mxu0 %v2028_v60 }
 0x61f   :  { %2061 = vmatpush3.bf16.msra.mxu1 %v2060_v52  ;;  %2031 = vmatprep.subr.bf16.mxu0 %v2030_v33  ;;  %v1457_v18 = vpop.permute.xlu0 %1456 }
 0x620   :  { %2063 = vmatprep.subr.bf16.mxu1 %v2062_v28  ;;  %v1464_v52 = vadd.f32 %v1457_v18, %v1444_v12  ;;  %v1463_v11 = vadd.f32 %v1457_v18, %v1443_v55  ;;  %v1465_v28 = vadd.f32 %v1457_v18, %v1445_v63  ;;  %v1710_v56 = vpop.permute.xlu1 %1709 }
 0x622   :  { %2033 = vmatpush3.bf16.msra.mxu0 %v2032_v32  ;;  %v1466_v32 = vadd.f32 %v1457_v18, %v1446_v16  ;;  %vm1472_vm4 = vcmp.ge.f32.partialorder %v1464_v52, 0.0  ;;  %v1480_v26 = vmul.f32 0.01, %v1464_v52  ;;  %vm1471_vm14 = vcmp.ge.f32.partialorder %v1463_v11, 0.0 }
 0x623   :  { %2065 = vmatpush3.bf16.msra.mxu1 %v2064_v40  ;;  %2035 = vmatprep.subr.bf16.mxu0 %v2034_v2  ;;  %v1481_v37 = vmul.f32 0.01, %v1465_v28  ;;  %vm1473_vm15 = vcmp.ge.f32.partialorder %v1465_v28, 0.0 }
 0x624   :  { %2067 = vmatprep.subr.bf16.mxu1 %v2066_v43  ;;  %v1482_v7 = vmul.f32 0.01, %v1466_v32  ;;  %vm1474_vm12 = vcmp.ge.f32.partialorder %v1466_v32, 0.0  ;;  %v1488_v30 = vsel %vm1472_vm4, %v1464_v52, %v1480_v26 }
 0x625   :  { %v1489_v39 = vsel %vm1473_vm15, %v1465_v28, %v1481_v37 }
 0x626   :  { %2037 = vmatpush3.bf16.msra.mxu0 %v2036_v1 }
 0x627   :  { %2069 = vmatpush3.bf16.msra.mxu1 %v2068_v54  ;;  %2039 = vmatprep.subr.bf16.mxu0 %v2038_v45  ;;  %v1479_v54 = vmul.f32 0.01, %v1463_v11  ;;  %v1490_v45 = vsel %vm1474_vm12, %v1466_v32, %v1482_v7 }
 0x628   :  { %2071 = vmatprep.subr.bf16.mxu1 %v2070_v35 }
 0x629   :  { %v1487_v46 = vsel %vm1471_vm14, %v1463_v11, %v1479_v54 }
 0x62a   :  { %2041 = vmatpush3.bf16.msra.mxu0 %v2040_v19 }
 0x62b   :  { %2073 = vmatpush3.bf16.msra.mxu1 %v2072_v0  ;;  %2074 = vmatprep.subr.bf16.mxu0 %v2105_v9 }
 0x6df   :  { %v1331_v48 = vpop.f32.mrb[8].mxu0 }
 0x6e0   :  { %v1332_v29 = vadd.f32 %v1331_v48, %v1260_v42  ;;  %v1333_v51 = vpop.f32.mrb[9].mxu0  ;;  %v1402_v22 = vpop.f32.mrb[8].mxu1 }
 0x6e1   :  { %v1334_v13 = vadd.f32 %v1333_v51, %v1260_v42  ;;  %v1403_v3 = vadd.f32 %v1402_v22, %v1260_v42  ;;  %v1404_v53 = vpop.f32.mrb[9].mxu1 }
 0x6e2   :  { %vm1407_vm0 = vcmp.ge.f32.partialorder %v1332_v29, 0.0  ;;  %v1411_v57 = vmul.f32 0.01, %v1332_v29  ;;  %v1405_v49 = vadd.f32 %v1404_v53, %v1260_v42 }
 0x6e3   :  { %vm1408_vm1 = vcmp.ge.f32.partialorder %v1334_v13, 0.0  ;;  %v1412_v59 = vmul.f32 0.01, %v1334_v13  ;;  %vm1409_vm2 = vcmp.ge.f32.partialorder %v1403_v3, 0.0  ;;  %v1413_v60 = vmul.f32 0.01, %v1403_v3 }
 0x6e4   :  { %v1415_v21 = vsel %vm1407_vm0, %v1332_v29, %v1411_v57  ;;  %vm1410_vm3 = vcmp.ge.f32.partialorder %v1405_v49, 0.0  ;;  %v1414_v62 = vmul.f32 0.01, %v1405_v49 }
 0x6e5   :  { %1419 = vst [vmem:[%s3147_s4] sm:$0xff] %v1415_v21  ;;  %v1439_v58 = vmul.f32 %v1432_v41, %v1415_v21  ;;  %v1416_v8 = vsel %vm1408_vm1, %v1334_v13, %v1412_v59  ;;  %v1417_v33 = vsel %vm1409_vm2, %v1403_v3, %v1413_v60 }
 0x6e6   :  { %1420 = vst [vmem:[%s3147_s4 + $0x8] sm:$0xff] %v1416_v8  ;;  %v1440_v25 = vmul.f32 %v1432_v41, %v1416_v8  ;;  %1421 = vst [vmem:[%s3147_s4 + $0x10] sm:$0xff] %v1417_v33  ;;  %v1441_v34 = vmul.f32 %v1432_v41, %v1417_v33  ;;  %v1418_v36 = vsel %vm1410_vm3, %v1405_v49, %v1414_v62 }
 0x6e7   :  { %1422 = vst [vmem:[%s3147_s4 + $0x18] sm:$0xff] %v1418_v36  ;;  %v1442_v20 = vmul.f32 %v1432_v41, %v1418_v36  ;;  %v1459_v23 = vadd.f32 %v1452_v47, %v1439_v58 }
 0x6e8   :  { %v1460_v40 = vadd.f32 %v1452_v47, %v1440_v25  ;;  %v1461_v24 = vadd.f32 %v1452_v47, %v1441_v34 }
 0x6e9   :  { %v1475_v44 = vmul.f32 0.01, %v1459_v23  ;;  %v1462_v2 = vadd.f32 %v1452_v47, %v1442_v20  ;;  %vm1467_vm6 = vcmp.ge.f32.partialorder %v1459_v23, 0.0 }
 0x6ea   :  { %vm1468_vm5 = vcmp.ge.f32.partialorder %v1460_v40, 0.0  ;;  %v1476_v27 = vmul.f32 0.01, %v1460_v40  ;;  %v1477_v14 = vmul.f32 0.01, %v1461_v24  ;;  %vm1469_vm8 = vcmp.ge.f32.partialorder %v1461_v24, 0.0 }
 0x6eb   :  { %vm1470_vm7 = vcmp.ge.f32.partialorder %v1462_v2, 0.0  ;;  %v1478_v1 = vmul.f32 0.01, %v1462_v2  ;;  %v1483_v4 = vsel %vm1467_vm6, %v1459_v23, %v1475_v44 }
 0x6ec   :  { %v1484_v5 = vsel %vm1468_vm5, %v1460_v40, %v1476_v27  ;;  %v1485_v38 = vsel %vm1469_vm8, %v1461_v24, %v1477_v14 }
 0x6ed   :  { %1619 = vmatprep.mubr.f32.mxu0 %v1484_v5  ;;  %v1486_v43 = vsel %vm1470_vm7, %v1462_v2, %v1478_v1 }
 0x6ee   :  { %1620 = vmatmul.mubr.f32.vlgmr.msra.gmra.mrb[10].mxu0 %v1483_v4  ;;  %1694 = vmatprep.mubr.f32.mxu1 %v1486_v43 }
 0x6ef   :  { %1624 = vmatprep.mubr.f32.mxu0 %v1488_v30  ;;  %1695 = vmatmul.mubr.f32.vlgmr.msra.gmra.mrb[10].mxu1 %v1485_v38 }
 0x6f0   :  { %1699 = vmatprep.mubr.f32.mxu1 %v1490_v45 }
 0x6f2   :  { %1625 = vmatmul.mubr.f32.gmra.mrb[12].mxu0 %v1487_v46 }
 0x6f3   :  { %1700 = vmatmul.mubr.f32.gmra.mrb[12].mxu1 %v1489_v39  ;;  %1895 = vmatprep.mubr.msk.f32.mxu0 %vm2106_vm9, %v2103_v17  ;;  %v1705_v17 = vld [vmem:[%s3145_s1 + $0x28] sm:$0xff] }
 0x7c1   :  { %v1844_v19 = vpop.f32.mrb[10].mxu0 }
 0x7c2   :  { %v1845_v35 = vpop.f32.mrb[11].mxu0  ;;  %v1882_v61 = vpop.f32.mrb[10].mxu1 }
 0x7c3   :  { %v1846_v10 = vadd.f32 %v1845_v35, %v1844_v19  ;;  %v1883_v0 = vpop.f32.mrb[11].mxu1 }
 0x7c4   :  { %v1884_v42 = vadd.f32 %v1883_v0, %v1882_v61 }
 0x7c5   :  { %v1847_v41 = vpop.f32.mrb[12].mxu0 }
 0x7c6   :  { %v1697_v47 = vadd.f32 %v1884_v42, %v1846_v10  ;;  %v1848_v50 = vpop.f32.mrb[13].mxu0  ;;  %v1885_v48 = vpop.f32.mrb[12].mxu1 }
 0x7c7   :  { %v1849_v29 = vadd.f32 %v1848_v50, %v1847_v41  ;;  %v1886_v51 = vpop.f32.mrb[13].mxu1 }
 0x7c8   :  { %v1887_v22 = vadd.f32 %v1886_v51, %v1885_v48 }
 0x7ca   :  { %v1702_v31 = vadd.f32 %v1887_v22, %v1849_v29 }
 0x7cc   :  { %v2075_v55 = vpack.c.bf16 %v1702_v31, %v1697_v47 }
 0x7ce   :  { %2076 = vmatpush3.bf16.msra.mxu0 %v2075_v55 }
 0x7d1   :  { %1896 = vmatmul.mubr.msk.f32.vlgmr.msra.gmra.mrb[14].mxu0 %vm536_vm13, %v1705_v17 }
 0x8a4   :  { %v1781_v12 = vpop.f32.mrb[14].mxu0 }
 0x8a5   :  { %v1782_v13 = vadd.f32 %v1781_v12, %v1710_v56  ;;  %v1897_v3 = vpop.f32.mrb[15].mxu0 }
 0x8a7   :  { %1785 = vst [vmem:[%s3150_s5] sm:$0xff] %v1782_v13 }

</bundles_post_ra>
